<compile_context>
chip_gen: v7x
topology: tpu7x:2x2x1
jax: 0.10.0
libtpu: 0.0.40
codegen_flags: <defaults>
</compile_context>

<pallas_src>
import jax
import jax.numpy as jnp
from jax.experimental import pallas as pl
from jax.experimental.pallas import tpu as pltpu

# ---------------- small synthetic shapes ----------------
B = 2                                   # batch
C = 3                                   # image channels (NCHW)
IMG = 32                                # spatial size
PATCH = 16                              # patch size
NPATCH = (IMG // PATCH) ** 2            # 4 patches per image
PATCH_DIM = C * PATCH * PATCH           # 768
VIS_HIDDEN = 256                        # stand-in for CLIP-L vision hidden width
FEAT_DIM = 768                          # CLIP-L projection dim (image & text features) -- fixed by module
MLP_HID = 768                           # nn.Linear(768, 768)                           -- fixed by module
OUT_DIM = 512                           # nn.Linear(768, 512)                           -- fixed by module

B_PAD = ((B + 7) // 8) * 8              # pad batch rows to a full sublane group (8)

# packed-vector lane offsets (all multiples of 128 -> static slices, no relayout)
_OFF_BE = 0
_OFF_GAMMA = _OFF_BE + VIS_HIDDEN        # 256
_OFF_BETA = _OFF_GAMMA + VIS_HIDDEN      # 512
_OFF_BF = _OFF_BETA + VIS_HIDDEN         # 768
_OFF_B2 = _OFF_BF + MLP_HID              # 1536
VEC_LEN = _OFF_B2 + OUT_DIM              # 2048


def _vmem_spec():
    # whole-array block resident in VMEM (total resident data ~1.6 MiB after the
    # wp@w1 fold + bf16 cast: fits all generations' default scoped VMEM, no grid needed)
    return pl.BlockSpec(memory_space=pltpu.MemorySpace.VMEM)


# ---------------- fused kernel ----------------
# synthetic get_image_features (patch-embed + LN + [proj folded into MLP-1]) + MLP head
def fused_encoder_kernel(x_ref, we_ref, wf_ref, w2_ref, vec_ref, out_ref):
    # static slices of the packed (1, 2048) vector ref -- free, lane offsets are 128-aligned
    be = vec_ref[:, _OFF_BE:_OFF_BE + VIS_HIDDEN]
    gamma = vec_ref[:, _OFF_GAMMA:_OFF_GAMMA + VIS_HIDDEN]
    beta = vec_ref[:, _OFF_BETA:_OFF_BETA + VIS_HIDDEN]
    bf = vec_ref[:, _OFF_BF:_OFF_BF + MLP_HID]
    b2 = vec_ref[:, _OFF_B2:_OFF_B2 + OUT_DIM]

    # patch embedding on the pre-pooled patch slab (pool commutes with the affine map):
    # (B_PAD, 768) bf16 @ (768, 256) bf16 -> f32
    emb = jnp.dot(x_ref[...], we_ref[...], preferred_element_type=jnp.float32) + be

    # post-layernorm (f32 VPU path)
    mu = jnp.mean(emb, axis=-1, keepdims=True)
    var = jnp.mean((emb - mu) ** 2, axis=-1, keepdims=True)
    normed = (emb - mu) * jax.lax.rsqrt(var + 1e-5)
    normed = normed * gamma + beta

    # combined_features = 1*image_features + 0*text_features (0-term dropped, dead work);
    # visual projection folded into MLP layer 1: (B_PAD,256) @ (256,768) + (bp@w1 + b1)
    h = jnp.dot(normed.astype(jnp.bfloat16), wf_ref[...],
                preferred_element_type=jnp.float32) + bf
    h = jnp.maximum(h, 0.0)                                            # ReLU

    # MLP layer 2: (B_PAD,768) @ (768,512) + b2
    out_ref[...] = (jnp.dot(h.astype(jnp.bfloat16), w2_ref[...],
                            preferred_element_type=jnp.float32) + b2)  # (B_PAD, 512) f32


# ---------------- glue ----------------
def extract_patches(x):
    """NCHW (B,C,H,W) -> (B, P, C*ph*pw), matching Conv2d(stride=kernel=patch) unrolling."""
    b, c, h, w = x.shape
    gh, gw = h // PATCH, w // PATCH
    x = x.reshape(b, c, gh, PATCH, gw, PATCH)
    x = x.transpose(0, 2, 4, 1, 3, 5)          # (B, gh, gw, C, ph, pw)
    return x.reshape(b, gh * gw, c * PATCH * PATCH)


def init_params(key):
    ks = jax.random.split(key, 4)
    s = 0.02
    return {
        # synthetic CLIP image tower
        "we": s * jax.random.normal(ks[0], (PATCH_DIM, VIS_HIDDEN), jnp.float32),
        "be": jnp.zeros((VIS_HIDDEN,), jnp.float32),
        "gamma": jnp.ones((VIS_HIDDEN,), jnp.float32),
        "beta": jnp.zeros((VIS_HIDDEN,), jnp.float32),
        "wp": s * jax.random.normal(ks[1], (VIS_HIDDEN, FEAT_DIM), jnp.float32),
        "bp": jnp.zeros((FEAT_DIM,), jnp.float32),
        # MLP head (exact module dims: 768 -> 768 -> 512)
        "w1": s * jax.random.normal(ks[2], (FEAT_DIM, MLP_HID), jnp.float32),
        "b1": jnp.zeros((MLP_HID,), jnp.float32),
        "w2": s * jax.random.normal(ks[3], (MLP_HID, OUT_DIM), jnp.float32),
        "b2": jnp.zeros((OUT_DIM,), jnp.float32),
    }


def prepare_kernel_params(params):
    """One-time offline fold/pack/cast (weights only -> do NOT redo per call)."""
    # exact fold: no nonlinearity between visual projection and MLP layer 1
    w_fused = params["wp"] @ params["w1"]                       # (256, 768) f32
    b_fused = params["bp"] @ params["w1"] + params["b1"]        # (768,)     f32
    packed_vecs = jnp.concatenate(
        [params["be"], params["gamma"], params["beta"], b_fused, params["b2"]]
    ).reshape(1, VEC_LEN).astype(jnp.float32)                   # (1, 2048) f32
    return {
        "we": params["we"].astype(jnp.bfloat16),                # (768, 256)
        "wf": w_fused.astype(jnp.bfloat16),                     # (256, 768)
        "w2": params["w2"].astype(jnp.bfloat16),                # (768, 512)
        "vecs": packed_vecs,                                    # (1, 2048)
    }


# advisory cost estimate (post-fold / bf16 / pooled-slab byte counts)
_FLOPS = 2 * B_PAD * (PATCH_DIM * VIS_HIDDEN + VIS_HIDDEN * MLP_HID + MLP_HID * OUT_DIM)
_BYTES = (2 * (B_PAD * PATCH_DIM                      # bf16 input slab
               + PATCH_DIM * VIS_HIDDEN               # we
               + VIS_HIDDEN * MLP_HID                 # w_fused
               + MLP_HID * OUT_DIM)                   # w2
          + 4 * (VEC_LEN + B_PAD * OUT_DIM))          # packed vectors + f32 output
_COST = pl.CostEstimate(flops=_FLOPS, transcendentals=B_PAD, bytes_accessed=_BYTES)


@jax.jit
def image_encoder_forward(image_tensor, text_features, kparams):
    # text_features is accepted for interface parity with the PyTorch module, but its
    # contribution is multiplied by 0 in the forward, so it never enters the kernel.
    del text_features

    patches = extract_patches(image_tensor)                      # (B, P, 768)
    # pooling is linear and commutes with the patch-embed matmul -> pool here (exact)
    pooled = jnp.mean(patches, axis=1)                           # (B, 768)
    pooled = jnp.pad(pooled, ((0, B_PAD - B), (0, 0)))           # (B_PAD, 768)
    slab = pooled.astype(jnp.bfloat16)

    out_padded = pl.pallas_call(
        fused_encoder_kernel,
        out_shape=jax.ShapeDtypeStruct((B_PAD, OUT_DIM), jnp.float32),
        in_specs=[_vmem_spec()] * 5,
        out_specs=_vmem_spec(),
        cost_estimate=_COST,
    )(slab, kparams["we"], kparams["wf"], kparams["w2"], kparams["vecs"])

    return out_padded[:B]                                        # (B, 512)


if __name__ == "__main__":
    key = jax.random.PRNGKey(0)
    k_img, k_txt, k_par = jax.random.split(key, 3)

    image_tensor = jax.random.normal(k_img, (B, C, IMG, IMG), jnp.float32)   # NCHW
    # TODO(synk): text tokenizer + CLIP text encoder omitted; deterministic stand-in features
    # (their contribution is multiplied by 0 in the forward anyway).
    text_features = jax.random.normal(k_txt, (B, FEAT_DIM), jnp.float32)

    params = init_params(k_par)
    kernel_params = prepare_kernel_params(params)   # one-time fold/pack/cast, outside jit

    out = image_encoder_forward(image_tensor, text_features, kernel_params)
    out = jax.block_until_ready(out)
    assert out.shape == (B, OUT_DIM) and out.dtype == jnp.float32
    assert bool(jnp.all(jnp.isfinite(out)))
    print("KERNEL_OK")
</pallas_src>

<mosaic_0001>
module attributes {stable_mosaic.version = 11 : i64} {
  func.func @fused_encoder_kernel(%arg0: memref<8x768xbf16, #tpu.memory_space<vmem>>, %arg1: memref<768x256xbf16, #tpu.memory_space<vmem>>, %arg2: memref<256x768xbf16, #tpu.memory_space<vmem>>, %arg3: memref<768x512xbf16, #tpu.memory_space<vmem>>, %arg4: memref<1x2048xf32, #tpu.memory_space<vmem>>, %arg5: memref<8x512xf32, #tpu.memory_space<vmem>>) attributes {dimension_semantics = [], scalar_prefetch = 0 : i64, scratch_operands = 0 : i64, tpu.core_type = #tpu.core_type<tc>} {
    %c0 = arith.constant 0 : index
    %c0_0 = arith.constant 0 : index
    %0 = vector.load %arg4[%c0, %c0_0] : memref<1x2048xf32, #tpu.memory_space<vmem>>, vector<1x256xf32>
    %c0_1 = arith.constant 0 : index
    %c256 = arith.constant 256 : index
    %1 = vector.load %arg4[%c0_1, %c256] : memref<1x2048xf32, #tpu.memory_space<vmem>>, vector<1x256xf32>
    %c0_2 = arith.constant 0 : index
    %c512 = arith.constant 512 : index
    %2 = vector.load %arg4[%c0_2, %c512] : memref<1x2048xf32, #tpu.memory_space<vmem>>, vector<1x256xf32>
    %c0_3 = arith.constant 0 : index
    %c768 = arith.constant 768 : index
    %3 = vector.load %arg4[%c0_3, %c768] : memref<1x2048xf32, #tpu.memory_space<vmem>>, vector<1x768xf32>
    %c0_4 = arith.constant 0 : index
    %c1536 = arith.constant 1536 : index
    %4 = vector.load %arg4[%c0_4, %c1536] : memref<1x2048xf32, #tpu.memory_space<vmem>>, vector<1x512xf32>
    %c0_5 = arith.constant 0 : index
    %c0_6 = arith.constant 0 : index
    %5 = vector.load %arg0[%c0_5, %c0_6] : memref<8x768xbf16, #tpu.memory_space<vmem>>, vector<8x768xbf16>
    %c0_7 = arith.constant 0 : index
    %c0_8 = arith.constant 0 : index
    %6 = vector.load %arg1[%c0_7, %c0_8] : memref<768x256xbf16, #tpu.memory_space<vmem>>, vector<768x256xbf16>
    %cst = arith.constant dense<0.000000e+00> : vector<8x256xf32>
    %7 = tpu.matmul %5, %6, %cst {dimension_numbers = #tpu.dot_dimension_numbers<[1], [0], [0], [1], [0, 0, 1, 1], [], []>} : vector<8x768xbf16>, vector<768x256xbf16>, vector<8x256xf32> -> vector<8x256xf32>
    %8 = vector.broadcast %0 : vector<1x256xf32> to vector<8x256xf32>
    %9 = arith.addf %7, %8 : vector<8x256xf32>
    %cst_9 = arith.constant dense<0.000000e+00> : vector<8xf32>
    %10 = vector.multi_reduction <add>, %9, %cst_9 [1] : vector<8x256xf32> to vector<8xf32>
    %11 = vector.shape_cast %10 : vector<8xf32> to vector<8x1xf32>
    %cst_10 = arith.constant 2.560000e+02 : f32
    %12 = vector.broadcast %cst_10 : f32 to vector<8x1xf32>
    %13 = arith.divf %11, %12 : vector<8x1xf32>
    %14 = vector.broadcast %13 : vector<8x1xf32> to vector<8x256xf32>
    %15 = arith.subf %9, %14 : vector<8x256xf32>
    %16 = arith.mulf %15, %15 : vector<8x256xf32>
    %cst_11 = arith.constant dense<0.000000e+00> : vector<8xf32>
    %17 = vector.multi_reduction <add>, %16, %cst_11 [1] : vector<8x256xf32> to vector<8xf32>
    %18 = vector.shape_cast %17 : vector<8xf32> to vector<8x1xf32>
    %cst_12 = arith.constant 2.560000e+02 : f32
    %19 = vector.broadcast %cst_12 : f32 to vector<8x1xf32>
    %20 = arith.divf %18, %19 : vector<8x1xf32>
    %21 = vector.broadcast %13 : vector<8x1xf32> to vector<8x256xf32>
    %22 = arith.subf %9, %21 : vector<8x256xf32>
    %cst_13 = arith.constant 9.99999974E-6 : f32
    %23 = vector.broadcast %cst_13 : f32 to vector<8x1xf32>
    %24 = arith.addf %20, %23 : vector<8x1xf32>
    %25 = math.rsqrt %24 : vector<8x1xf32>
    %26 = vector.broadcast %25 : vector<8x1xf32> to vector<8x256xf32>
    %27 = arith.mulf %22, %26 : vector<8x256xf32>
    %28 = vector.broadcast %1 : vector<1x256xf32> to vector<8x256xf32>
    %29 = arith.mulf %27, %28 : vector<8x256xf32>
    %30 = vector.broadcast %2 : vector<1x256xf32> to vector<8x256xf32>
    %31 = arith.addf %29, %30 : vector<8x256xf32>
    %32 = arith.truncf %31 : vector<8x256xf32> to vector<8x256xbf16>
    %c0_14 = arith.constant 0 : index
    %c0_15 = arith.constant 0 : index
    %33 = vector.load %arg2[%c0_14, %c0_15] : memref<256x768xbf16, #tpu.memory_space<vmem>>, vector<256x768xbf16>
    %cst_16 = arith.constant dense<0.000000e+00> : vector<8x768xf32>
    %34 = tpu.matmul %32, %33, %cst_16 {dimension_numbers = #tpu.dot_dimension_numbers<[1], [0], [0], [1], [0, 0, 1, 1], [], []>} : vector<8x256xbf16>, vector<256x768xbf16>, vector<8x768xf32> -> vector<8x768xf32>
    %35 = vector.broadcast %3 : vector<1x768xf32> to vector<8x768xf32>
    %36 = arith.addf %34, %35 : vector<8x768xf32>
    %cst_17 = arith.constant 0.000000e+00 : f32
    %37 = vector.broadcast %cst_17 : f32 to vector<8x768xf32>
    %38 = arith.maximumf %36, %37 : vector<8x768xf32>
    %39 = arith.truncf %38 : vector<8x768xf32> to vector<8x768xbf16>
    %c0_18 = arith.constant 0 : index
    %c0_19 = arith.constant 0 : index
    %40 = vector.load %arg3[%c0_18, %c0_19] : memref<768x512xbf16, #tpu.memory_space<vmem>>, vector<768x512xbf16>
    %cst_20 = arith.constant dense<0.000000e+00> : vector<8x512xf32>
    %41 = tpu.matmul %39, %40, %cst_20 {dimension_numbers = #tpu.dot_dimension_numbers<[1], [0], [0], [1], [0, 0, 1, 1], [], []>} : vector<8x768xbf16>, vector<768x512xbf16>, vector<8x512xf32> -> vector<8x512xf32>
    %42 = vector.broadcast %4 : vector<1x512xf32> to vector<8x512xf32>
    %43 = arith.addf %41, %42 : vector<8x512xf32>
    %c0_21 = arith.constant 0 : index
    %c0_22 = arith.constant 0 : index
    %44 = vector.load %arg5[%c0_21, %c0_22] : memref<8x512xf32, #tpu.memory_space<vmem>>, vector<8x512xf32>
    tpu.vector_store %arg5[%c0_21, %c0_22], %43 {strides = array<i32>} : memref<8x512xf32, #tpu.memory_space<vmem>>, vector<8x512xf32>,
    return
  }
}

</mosaic_0001>

<bundles_post_ra>
// kernel: image_encoder_forward.1
= control target key start
LH: loop header
LB: loop body
LE: loop exit
PB: predicated region body
PF: predicated region fallthrough
CT: control target
= control target key end

     0   :  { %10 = vsyncpa [#allocation3], 0  ;;  %s4505_s0 = inlined_call_operand.vmem [shape: bf16[8,768], index: 0, kind: input, shape index: {}]   ;;  %s4506_s1 = inlined_call_operand.vmem [shape: bf16[768,256], index: 1, kind: input, shape index: {}]   ;;  %s4507_s2 = inlined_call_operand.hbm [shape: bf16[256,768], index: 2, kind: input, shape index: {}]   ;;  %s4508_s3 = inlined_call_operand.hbm [shape: bf16[768,512], index: 3, kind: input, shape index: {}]   ;;  %s4509_s4 = inlined_call_operand.vmem [shape: f32[1,2048], index: 4, kind: input, shape index: {}]   ;;  %s4510_s5 = inlined_call_operand.vmem [shape: f32[8,512], index: 5, kind: output, shape index: {}]  }
   0x1   :  { %11 = vsyncpa [#allocation5], 0  ;;  %s4061_s18 = smov [#allocation2]   ;;  %s4013_s22 = scalar_lea.hbm %s4507_s2, 12288 }
   0x2   :  { %s21_s19 = sshll.u32 %s4061_s18, 4  ;;  %p4014_p0 = scmp.ne.s32.totalorder %s4507_s2, %s4013_s22  ;;  %s22_s19 = int_to_ptr.vmem [resolvable:$true] %s21_s19 }
   0x3   :  { %p4017_p1 = scmp.lt.u32.totalorder %s4013_s22, %s4507_s2 }
   0x5   :  { %p4019_p2 = pnand %p4017_p1, %p4014_p0 }
   0x7   :  { %4022 = shalt.err (!%p4019_p2)
}
   0x8   :  { %s4023_s27 = scalar_lea.vmem %s22_s19, 12288  ;;  %p4028_p4 = scmp.lt.s32.totalorder %s22_s19, %s22_s19 }
   0x9   :  { %p4024_p3 = scmp.ne.s32.totalorder %s22_s19, %s4023_s27  ;;  %p4029_p5 = scmp.lt.s32.totalorder %s4023_s27, %s4023_s27 }
   0xb   :  { %p4030_p6 = por %p4029_p5, %p4028_p4 }
   0xd   :  { %p4031_p7 = pnand %p4030_p6, %p4024_p3 }
   0xf   :  { %4034 = shalt.err (!%p4031_p7)
}
  0x10   :  { %s4062_s28 = smov 384   ;;  %s4063_s29 = smov 24  }
  0x11   :  { %27 = dma.hbm_to_vmem [thread:$0]  %s4507_s2, 12288, %s22_s19, [#allocation3], %s4062_s28, %s4062_s28, %s4063_s29  }
  0x12   :  { %s4064_s7 = smov [#allocation4]   ;;  %s4035_s11 = scalar_lea.hbm %s4508_s3, 24576 }
  0x13   :  { %s33_s8 = sshll.u32 %s4064_s7, 4  ;;  %p4036_p8 = scmp.ne.s32.totalorder %s4508_s3, %s4035_s11  ;;  %s34_s8 = int_to_ptr.vmem [resolvable:$true] %s33_s8 }
  0x14   :  { %p4039_p9 = scmp.lt.u32.totalorder %s4035_s11, %s4508_s3 }
  0x16   :  { %p4041_p10 = pnand %p4039_p9, %p4036_p8 }
  0x18   :  { %4044 = shalt.err (!%p4041_p10)
}
  0x19   :  { %s4045_s16 = scalar_lea.vmem %s34_s8, 24576  ;;  %p4050_p12 = scmp.lt.s32.totalorder %s34_s8, %s34_s8 }
  0x1a   :  { %p4046_p11 = scmp.ne.s32.totalorder %s34_s8, %s4045_s16  ;;  %p4051_p13 = scmp.lt.s32.totalorder %s4045_s16, %s4045_s16 }
  0x1c   :  { %p4052_p0 = por %p4051_p13, %p4050_p12 }
  0x1e   :  { %p4053_p1 = pnand %p4052_p0, %p4046_p11 }
  0x20   :  { %4056 = shalt.err (!%p4053_p1)
}
  0x21   :  { %s4065_s2 = smov 256   ;;  %s4066_s17 = smov 16  }
  0x22   :  { %39 = dma.hbm_to_vmem [thread:$0]  %s4508_s3, 24576, %s34_s8, [#allocation5], %s4065_s2, %s4065_s2, %s4066_s17  }
  0x23   :  { %4057 = dma.done.wait [#allocation3], 12288  }
  0x24   :  { %4058 = vsyncadd [#allocation3], 4294955008 }
  0x25   :  { %4059 = dma.done.wait [#allocation5], 24576  }
  0x26   :  { %4060 = vsyncadd [#allocation5], 4294942720  ;;  %v3429_v0 = vld [vmem:[%s4506_s1 + $0x4] ss:$8 sps:$4 sm:$0xff]   ;;  %v3431_v1 = vld [vmem:[%s4506_s1] ss:$8 sps:$4 sm:$0xff]  }
  0x27   :  { %664 = vmatprep.subr.bf16.mxu0 %v3429_v0  ;;  %v3432_v2 = vld [vmem:[%s4506_s1 + $0x14] ss:$8 sps:$4 sm:$0xff]   ;;  %v3434_v3 = vld [vmem:[%s4506_s1 + $0x10] ss:$8 sps:$4 sm:$0xff]   ;;  %v3435_v4 = vld [vmem:[%s4506_s1 + $0x24] ss:$8 sps:$4 sm:$0xff]  }
  0x28   :  { %665 = vmatpush1.bf16.msra.mxu0 %v3431_v1  ;;  %v3437_v5 = vld [vmem:[%s4506_s1 + $0x20] ss:$8 sps:$4 sm:$0xff]   ;;  %v3438_v6 = vld [vmem:[%s4506_s1 + $0x34] ss:$8 sps:$4 sm:$0xff]   ;;  %v3440_v7 = vld [vmem:[%s4506_s1 + $0x30] ss:$8 sps:$4 sm:$0xff]  }
  0x29   :  { %666 = vmatprep.subr.bf16.mxu0 %v3432_v2  ;;  %v3441_v8 = vld [vmem:[%s4506_s1 + $0x44] ss:$8 sps:$4 sm:$0xff]   ;;  %v3443_v9 = vld [vmem:[%s4506_s1 + $0x40] ss:$8 sps:$4 sm:$0xff]   ;;  %v3444_v10 = vld [vmem:[%s4506_s1 + $0x54] ss:$8 sps:$4 sm:$0xff]  }
  0x2a   :  { %v3446_v11 = vld [vmem:[%s4506_s1 + $0x50] ss:$8 sps:$4 sm:$0xff]   ;;  %v3447_v12 = vld [vmem:[%s4506_s1 + $0x64] ss:$8 sps:$4 sm:$0xff]   ;;  %v3449_v15 = vld [vmem:[%s4506_s1 + $0x60] ss:$8 sps:$4 sm:$0xff]  }
  0x2b   :  { %v53_v13 = vld [vmem:[%s4505_s0] sm:$0xff]  ;;  %v3450_v16 = vld [vmem:[%s4506_s1 + $0x74] ss:$8 sps:$4 sm:$0xff]   ;;  %v3452_v17 = vld [vmem:[%s4506_s1 + $0x70] ss:$8 sps:$4 sm:$0xff]  }
  0x2c   :  { %667 = vmatpush1.bf16.msra.mxu0 %v3434_v3  ;;  %v3004_v14 = vcombine.high %v53_v13, %v53_v13  ;;  %v3453_v18 = vld [vmem:[%s4506_s1 + $0x84] ss:$8 sps:$4 sm:$0xff]   ;;  %v3455_v19 = vld [vmem:[%s4506_s1 + $0x80] ss:$8 sps:$4 sm:$0xff]   ;;  %v3456_v20 = vld [vmem:[%s4506_s1 + $0x94] ss:$8 sps:$4 sm:$0xff]   ;;  %v3003_v36 = vcombine.low %v53_v13, %v53_v13 }
  0x2d   :  { %668 = vmatprep.subr.bf16.mxu0 %v3435_v4  ;;  %v3458_v21 = vld [vmem:[%s4506_s1 + $0x90] ss:$8 sps:$4 sm:$0xff]   ;;  %v3459_v22 = vld [vmem:[%s4506_s1 + $0xa4] ss:$8 sps:$4 sm:$0xff]   ;;  %v3461_v23 = vld [vmem:[%s4506_s1 + $0xa0] ss:$8 sps:$4 sm:$0xff]  }
  0x2e   :  { %696 = vmatprep.mubr.bf16.mxu0 %v3004_v14  ;;  %v3462_v24 = vld [vmem:[%s4506_s1 + $0xb4] ss:$8 sps:$4 sm:$0xff]   ;;  %v3464_v25 = vld [vmem:[%s4506_s1 + $0xb0] ss:$8 sps:$4 sm:$0xff]   ;;  %v3465_v26 = vld [vmem:[%s4506_s1 + $0xc4] ss:$8 sps:$4 sm:$0xff]  }
  0x2f   :  { %v3467_v27 = vld [vmem:[%s4506_s1 + $0xc0] ss:$8 sps:$4 sm:$0xff]   ;;  %v3468_v28 = vld [vmem:[%s4506_s1 + $0xd4] ss:$8 sps:$4 sm:$0xff]   ;;  %v3470_v29 = vld [vmem:[%s4506_s1 + $0xd0] ss:$8 sps:$4 sm:$0xff]  }
  0x30   :  { %669 = vmatpush1.bf16.msra.mxu0 %v3437_v5  ;;  %v3471_v30 = vld [vmem:[%s4506_s1 + $0xe4] ss:$8 sps:$4 sm:$0xff]   ;;  %v3473_v31 = vld [vmem:[%s4506_s1 + $0xe0] ss:$8 sps:$4 sm:$0xff]   ;;  %v3474_v32 = vld [vmem:[%s4506_s1 + $0xf4] ss:$8 sps:$4 sm:$0xff]  }
  0x31   :  { %670 = vmatprep.subr.bf16.mxu0 %v3438_v6  ;;  %v3476_v33 = vld [vmem:[%s4506_s1 + $0xf0] ss:$8 sps:$4 sm:$0xff]   ;;  %v3481_v34 = vld [vmem:[%s4506_s1 + $0x104] ss:$8 sps:$4 sm:$0xff]   ;;  %v3479_v37 = vld [vmem:[%s4506_s1 + $0x100] ss:$8 sps:$4 sm:$0xff]  }
  0x32   :  { %v4226_v35 = vld [vmem:[%s4505_s0 + $0x8] sm:$0xff]  ;;  %v3484_v39 = vld [vmem:[%s4506_s1 + $0x114] ss:$8 sps:$4 sm:$0xff]   ;;  %v3482_v40 = vld [vmem:[%s4506_s1 + $0x110] ss:$8 sps:$4 sm:$0xff]  }
  0x33   :  { %v3006_v38 = vcombine.high %v4226_v35, %v4226_v35  ;;  %v3487_v41 = vld [vmem:[%s4506_s1 + $0x124] ss:$8 sps:$4 sm:$0xff]   ;;  %v3485_v42 = vld [vmem:[%s4506_s1 + $0x120] ss:$8 sps:$4 sm:$0xff]   ;;  %v3490_v43 = vld [vmem:[%s4506_s1 + $0x134] ss:$8 sps:$4 sm:$0xff]  }
  0x34   :  { %671 = vmatpush1.bf16.msra.mxu0 %v3440_v7  ;;  %v3488_v44 = vld [vmem:[%s4506_s1 + $0x130] ss:$8 sps:$4 sm:$0xff]   ;;  %v3493_v45 = vld [vmem:[%s4506_s1 + $0x144] ss:$8 sps:$4 sm:$0xff]   ;;  %v3491_v46 = vld [vmem:[%s4506_s1 + $0x140] ss:$8 sps:$4 sm:$0xff]  }
  0x35   :  { %672 = vmatprep.subr.bf16.mxu0 %v3441_v8  ;;  %v3496_v47 = vld [vmem:[%s4506_s1 + $0x154] ss:$8 sps:$4 sm:$0xff]   ;;  %v3494_v48 = vld [vmem:[%s4506_s1 + $0x150] ss:$8 sps:$4 sm:$0xff]   ;;  %v3499_v49 = vld [vmem:[%s4506_s1 + $0x164] ss:$8 sps:$4 sm:$0xff]   ;;  %v3005_v8 = vcombine.low %v4226_v35, %v4226_v35 }
  0x36   :  { %v3497_v50 = vld [vmem:[%s4506_s1 + $0x160] ss:$8 sps:$4 sm:$0xff]   ;;  %v3502_v51 = vld [vmem:[%s4506_s1 + $0x174] ss:$8 sps:$4 sm:$0xff]   ;;  %v3500_v52 = vld [vmem:[%s4506_s1 + $0x170] ss:$8 sps:$4 sm:$0xff]  }
  0x37   :  { %v3505_v53 = vld [vmem:[%s4506_s1 + $0x184] ss:$8 sps:$4 sm:$0xff]   ;;  %v3503_v54 = vld [vmem:[%s4506_s1 + $0x180] ss:$8 sps:$4 sm:$0xff]   ;;  %v3508_v55 = vld [vmem:[%s4506_s1 + $0x194] ss:$8 sps:$4 sm:$0xff]  }
  0x38   :  { %673 = vmatpush1.bf16.msra.mxu0 %v3443_v9  ;;  %v3506_v56 = vld [vmem:[%s4506_s1 + $0x190] ss:$8 sps:$4 sm:$0xff]   ;;  %v3511_v57 = vld [vmem:[%s4506_s1 + $0x1a4] ss:$8 sps:$4 sm:$0xff]   ;;  %v3509_v58 = vld [vmem:[%s4506_s1 + $0x1a0] ss:$8 sps:$4 sm:$0xff]  }
  0x39   :  { %674 = vmatprep.subr.bf16.mxu0 %v3444_v10  ;;  %v3514_v59 = vld [vmem:[%s4506_s1 + $0x1b4] ss:$8 sps:$4 sm:$0xff]   ;;  %v3512_v60 = vld [vmem:[%s4506_s1 + $0x1b0] ss:$8 sps:$4 sm:$0xff]   ;;  %v3517_v61 = vld [vmem:[%s4506_s1 + $0x1c4] ss:$8 sps:$4 sm:$0xff]  }
  0x3a   :  { %v3515_v62 = vld [vmem:[%s4506_s1 + $0x1c0] ss:$8 sps:$4 sm:$0xff]   ;;  %v3520_v63 = vld [vmem:[%s4506_s1 + $0x1d4] ss:$8 sps:$4 sm:$0xff]   ;;  %v3518_v0 = vld [vmem:[%s4506_s1 + $0x1d0] ss:$8 sps:$4 sm:$0xff]  }
  0x3b   :  { %v3523_v1 = vld [vmem:[%s4506_s1 + $0x1e4] ss:$8 sps:$4 sm:$0xff]   ;;  %v3521_v2 = vld [vmem:[%s4506_s1 + $0x1e0] ss:$8 sps:$4 sm:$0xff]   ;;  %v3526_v3 = vld [vmem:[%s4506_s1 + $0x1f4] ss:$8 sps:$4 sm:$0xff]  }
  0x3c   :  { %675 = vmatpush1.bf16.msra.mxu0 %v3446_v11  ;;  %v3524_v4 = vld [vmem:[%s4506_s1 + $0x1f0] ss:$8 sps:$4 sm:$0xff]   ;;  %v3531_v5 = vld [vmem:[%s4506_s1 + $0x204] ss:$8 sps:$4 sm:$0xff]   ;;  %v3529_v7 = vld [vmem:[%s4506_s1 + $0x200] ss:$8 sps:$4 sm:$0xff]  }
  0x3d   :  { %676 = vmatprep.subr.bf16.mxu0 %v3447_v12  ;;  %v4329_v6 = vld [vmem:[%s4505_s0 + $0x10] sm:$0xff]  ;;  %v3537_v12 = vld [vmem:[%s4506_s1 + $0x224] ss:$8 sps:$4 sm:$0xff]   ;;  %v3535_v13 = vld [vmem:[%s4506_s1 + $0x220] ss:$8 sps:$4 sm:$0xff]  }
  0x3e   :  { %v3534_v9 = vld [vmem:[%s4506_s1 + $0x214] ss:$8 sps:$4 sm:$0xff]   ;;  %v3008_v10 = vcombine.high %v4329_v6, %v4329_v6  ;;  %v3532_v11 = vld [vmem:[%s4506_s1 + $0x210] ss:$8 sps:$4 sm:$0xff]  }
  0x3f   :  { %v3540_v14 = vld [vmem:[%s4506_s1 + $0x234] ss:$8 sps:$4 sm:$0xff]   ;;  %v3568_v35 = vld [vmem:[%s4506_s1 + $0x2d0] ss:$8 sps:$4 sm:$0xff]  }
  0x40   :  { %677 = vmatpush1.bf16.msra.mxu0 %v3449_v15  ;;  %v3538_v15 = vld [vmem:[%s4506_s1 + $0x230] ss:$8 sps:$4 sm:$0xff]  }
  0x41   :  { %678 = vmatprep.subr.bf16.mxu0 %v3450_v16  ;;  %v3543_v16 = vld [vmem:[%s4506_s1 + $0x244] ss:$8 sps:$4 sm:$0xff]  }
  0x44   :  { %679 = vmatpush1.bf16.msra.mxu0 %v3452_v17  ;;  %v3541_v17 = vld [vmem:[%s4506_s1 + $0x240] ss:$8 sps:$4 sm:$0xff]  }
  0x45   :  { %680 = vmatprep.subr.bf16.mxu0 %v3453_v18  ;;  %v3546_v18 = vld [vmem:[%s4506_s1 + $0x254] ss:$8 sps:$4 sm:$0xff]  }
  0x48   :  { %681 = vmatpush1.bf16.msra.mxu0 %v3455_v19  ;;  %v3544_v19 = vld [vmem:[%s4506_s1 + $0x250] ss:$8 sps:$4 sm:$0xff]  }
  0x49   :  { %682 = vmatprep.subr.bf16.mxu0 %v3456_v20  ;;  %v3549_v20 = vld [vmem:[%s4506_s1 + $0x264] ss:$8 sps:$4 sm:$0xff]  }
  0x4c   :  { %683 = vmatpush1.bf16.msra.mxu0 %v3458_v21  ;;  %v3547_v21 = vld [vmem:[%s4506_s1 + $0x260] ss:$8 sps:$4 sm:$0xff]  }
  0x4d   :  { %684 = vmatprep.subr.bf16.mxu0 %v3459_v22  ;;  %v3552_v22 = vld [vmem:[%s4506_s1 + $0x274] ss:$8 sps:$4 sm:$0xff]  }
  0x50   :  { %685 = vmatpush1.bf16.msra.mxu0 %v3461_v23  ;;  %v3550_v23 = vld [vmem:[%s4506_s1 + $0x270] ss:$8 sps:$4 sm:$0xff]  }
  0x51   :  { %686 = vmatprep.subr.bf16.mxu0 %v3462_v24  ;;  %v3555_v24 = vld [vmem:[%s4506_s1 + $0x284] ss:$8 sps:$4 sm:$0xff]  }
  0x54   :  { %687 = vmatpush1.bf16.msra.mxu0 %v3464_v25  ;;  %v3553_v25 = vld [vmem:[%s4506_s1 + $0x280] ss:$8 sps:$4 sm:$0xff]  }
  0x55   :  { %688 = vmatprep.subr.bf16.mxu0 %v3465_v26  ;;  %v3558_v26 = vld [vmem:[%s4506_s1 + $0x294] ss:$8 sps:$4 sm:$0xff]  }
  0x58   :  { %689 = vmatpush1.bf16.msra.mxu0 %v3467_v27  ;;  %v3556_v27 = vld [vmem:[%s4506_s1 + $0x290] ss:$8 sps:$4 sm:$0xff]  }
  0x59   :  { %690 = vmatprep.subr.bf16.mxu0 %v3468_v28  ;;  %v3561_v28 = vld [vmem:[%s4506_s1 + $0x2a4] ss:$8 sps:$4 sm:$0xff]  }
  0x5c   :  { %691 = vmatpush1.bf16.msra.mxu0 %v3470_v29  ;;  %v3559_v29 = vld [vmem:[%s4506_s1 + $0x2a0] ss:$8 sps:$4 sm:$0xff]  }
  0x5d   :  { %692 = vmatprep.subr.bf16.mxu0 %v3471_v30  ;;  %v3564_v30 = vld [vmem:[%s4506_s1 + $0x2b4] ss:$8 sps:$4 sm:$0xff]  }
  0x60   :  { %693 = vmatpush1.bf16.msra.mxu0 %v3473_v31  ;;  %v3562_v31 = vld [vmem:[%s4506_s1 + $0x2b0] ss:$8 sps:$4 sm:$0xff]  }
  0x61   :  { %694 = vmatprep.subr.bf16.mxu0 %v3474_v32  ;;  %v3567_v32 = vld [vmem:[%s4506_s1 + $0x2c4] ss:$8 sps:$4 sm:$0xff]  }
  0x64   :  { %695 = vmatpush1.bf16.msra.mxu0 %v3476_v33  ;;  %v3565_v33 = vld [vmem:[%s4506_s1 + $0x2c0] ss:$8 sps:$4 sm:$0xff]  }
  0x65   :  { %705 = vmatprep.subr.bf16.mxu0 %v3481_v34  ;;  %v3570_v34 = vld [vmem:[%s4506_s1 + $0x2d4] ss:$8 sps:$4 sm:$0xff]  }
  0x67   :  { %697 = vmatmul.mubr.bf16.vlgmr.msra.gmra.mrb[0].mxu0 %v3003_v36  ;;  %v3573_v36 = vld [vmem:[%s4506_s1 + $0x2e4] ss:$8 sps:$4 sm:$0xff]  }
  0x68   :  { %706 = vmatpush1.bf16.msra.mxu0 %v3479_v37  ;;  %737 = vmatprep.mubr.bf16.mxu0 %v3006_v38  ;;  %v3571_v37 = vld [vmem:[%s4506_s1 + $0x2e0] ss:$8 sps:$4 sm:$0xff]   ;;  %v3576_v38 = vld [vmem:[%s4506_s1 + $0x2f4] ss:$8 sps:$4 sm:$0xff]  }
  0x69   :  { %707 = vmatprep.subr.bf16.mxu0 %v3484_v39  ;;  %v3574_v39 = vld [vmem:[%s4506_s1 + $0x2f0] ss:$8 sps:$4 sm:$0xff]  }
  0x6c   :  { %708 = vmatpush1.bf16.msra.mxu0 %v3482_v40  ;;  %v3007_v40 = vcombine.low %v4329_v6, %v4329_v6  ;;  %v3602_v6 = vld [vmem:[#allocation2 + $0x150] ss:$24 sps:$4 sm:$0xff]  }
  0x6d   :  { %709 = vmatprep.subr.bf16.mxu0 %v3487_v41  ;;  %v153_v41 = vlaneseq }
  0x70   :  { %710 = vmatpush1.bf16.msra.mxu0 %v3485_v42  ;;  %v4430_v42 = vshrl.u32 %v153_v41, 7 }
  0x71   :  { %711 = vmatprep.subr.bf16.mxu0 %v3490_v43 }
  0x72   :  { %v4433_v43 = vsub.s32 0, %v4430_v42 }
  0x74   :  { %712 = vmatpush1.bf16.msra.mxu0 %v3488_v44  ;;  %v48_v44 = vld [vmem:[%s4509_s4] sm:$0x3] }
  0x75   :  { %713 = vmatprep.subr.bf16.mxu0 %v3493_v45  ;;  %v4439_v45 = vsub.s32 1, %v4430_v42 }
  0x78   :  { %714 = vmatpush1.bf16.msra.mxu0 %v3491_v46  ;;  %v156_v46 = vrot.slane %v48_v44, %v4433_v43 }
  0x79   :  { %715 = vmatprep.subr.bf16.mxu0 %v3496_v47  ;;  %v160_v47 = vrot.slane %v48_v44, %v4439_v45 }
  0x7c   :  { %716 = vmatpush1.bf16.msra.mxu0 %v3494_v48 }
  0x7d   :  { %717 = vmatprep.subr.bf16.mxu0 %v3499_v49 }
  0x80   :  { %718 = vmatpush1.bf16.msra.mxu0 %v3497_v50 }
  0x81   :  { %719 = vmatprep.subr.bf16.mxu0 %v3502_v51 }
  0x84   :  { %720 = vmatpush1.bf16.msra.mxu0 %v3500_v52 }
  0x85   :  { %721 = vmatprep.subr.bf16.mxu0 %v3505_v53 }
  0x88   :  { %722 = vmatpush1.bf16.msra.mxu0 %v3503_v54 }
  0x89   :  { %723 = vmatprep.subr.bf16.mxu0 %v3508_v55  ;;  %v3579_v55 = vld [vmem:[#allocation2 + $0x4] ss:$24 sps:$4 sm:$0xff]  }
  0x8a   :  { %1439 = vmatprep.subr.bf16.mxu1 %v3579_v55  ;;  %v3725_v55 = vld [vmem:[#allocation4 + $0x4] ss:$16 sps:$4 sm:$0xff]  }
  0x8c   :  { %724 = vmatpush1.bf16.msra.mxu0 %v3506_v56  ;;  %v3581_v56 = vld [vmem:[#allocation2] ss:$24 sps:$4 sm:$0xff]  }
  0x8d   :  { %725 = vmatprep.subr.bf16.mxu0 %v3511_v57  ;;  %v3582_v57 = vld [vmem:[#allocation2 + $0x34] ss:$24 sps:$4 sm:$0xff]   ;;  %1440 = vmatpush1.bf16.msra.mxu1 %v3581_v56  ;;  %v3630_v56 = vld [vmem:[#allocation2 + $0x38] ss:$24 sps:$4 sm:$0xff]  }
  0x8e   :  { %1441 = vmatprep.subr.bf16.mxu1 %v3582_v57  ;;  %v3731_v57 = vld [vmem:[#allocation4 + $0x24] ss:$16 sps:$4 sm:$0xff]  }
  0x90   :  { %726 = vmatpush1.bf16.msra.mxu0 %v3509_v58  ;;  %v3584_v58 = vld [vmem:[#allocation2 + $0x30] ss:$24 sps:$4 sm:$0xff]  }
  0x91   :  { %727 = vmatprep.subr.bf16.mxu0 %v3514_v59  ;;  %v3585_v59 = vld [vmem:[#allocation2 + $0x64] ss:$24 sps:$4 sm:$0xff]   ;;  %1442 = vmatpush1.bf16.msra.mxu1 %v3584_v58 }
  0x92   :  { %1443 = vmatprep.subr.bf16.mxu1 %v3585_v59  ;;  %v3635_v58 = vld [vmem:[#allocation2 + $0x6c] ss:$24 sps:$4 sm:$0xff]   ;;  %v3729_v59 = vld [vmem:[#allocation4 + $0x20] ss:$16 sps:$4 sm:$0xff]  }
  0x94   :  { %728 = vmatpush1.bf16.msra.mxu0 %v3512_v60  ;;  %v3587_v60 = vld [vmem:[#allocation2 + $0x60] ss:$24 sps:$4 sm:$0xff]  }
  0x95   :  { %729 = vmatprep.subr.bf16.mxu0 %v3517_v61  ;;  %v3588_v61 = vld [vmem:[#allocation2 + $0x94] ss:$24 sps:$4 sm:$0xff]   ;;  %1444 = vmatpush1.bf16.msra.mxu1 %v3587_v60  ;;  %v3633_v60 = vld [vmem:[#allocation2 + $0x68] ss:$24 sps:$4 sm:$0xff]  }
  0x96   :  { %1445 = vmatprep.subr.bf16.mxu1 %v3588_v61  ;;  %v3737_v61 = vld [vmem:[#allocation4 + $0x44] ss:$16 sps:$4 sm:$0xff]  }
  0x98   :  { %730 = vmatpush1.bf16.msra.mxu0 %v3515_v62  ;;  %v3590_v62 = vld [vmem:[#allocation2 + $0x90] ss:$24 sps:$4 sm:$0xff]  }
  0x99   :  { %731 = vmatprep.subr.bf16.mxu0 %v3520_v63  ;;  %v3591_v63 = vld [vmem:[#allocation2 + $0xc4] ss:$24 sps:$4 sm:$0xff]   ;;  %1446 = vmatpush1.bf16.msra.mxu1 %v3590_v62 }
  0x9a   :  { %1447 = vmatprep.subr.bf16.mxu1 %v3591_v63  ;;  %v3638_v62 = vld [vmem:[#allocation2 + $0x9c] ss:$24 sps:$4 sm:$0xff]   ;;  %v3735_v63 = vld [vmem:[#allocation4 + $0x40] ss:$16 sps:$4 sm:$0xff]  }
  0x9c   :  { %732 = vmatpush1.bf16.msra.mxu0 %v3518_v0  ;;  %v3593_v0 = vld [vmem:[#allocation2 + $0xc0] ss:$24 sps:$4 sm:$0xff]  }
  0x9d   :  { %733 = vmatprep.subr.bf16.mxu0 %v3523_v1  ;;  %v3594_v1 = vld [vmem:[#allocation2 + $0xf4] ss:$24 sps:$4 sm:$0xff]   ;;  %1448 = vmatpush1.bf16.msra.mxu1 %v3593_v0  ;;  %v3636_v0 = vld [vmem:[#allocation2 + $0x98] ss:$24 sps:$4 sm:$0xff]  }
  0x9e   :  { %1449 = vmatprep.subr.bf16.mxu1 %v3594_v1  ;;  %v3743_v1 = vld [vmem:[#allocation4 + $0x64] ss:$16 sps:$4 sm:$0xff]  }
  0xa0   :  { %734 = vmatpush1.bf16.msra.mxu0 %v3521_v2  ;;  %v3596_v2 = vld [vmem:[#allocation2 + $0xf0] ss:$24 sps:$4 sm:$0xff]  }
  0xa1   :  { %735 = vmatprep.subr.bf16.mxu0 %v3526_v3  ;;  %v3597_v3 = vld [vmem:[#allocation2 + $0x124] ss:$24 sps:$4 sm:$0xff]   ;;  %1450 = vmatpush1.bf16.msra.mxu1 %v3596_v2 }
  0xa2   :  { %1451 = vmatprep.subr.bf16.mxu1 %v3597_v3  ;;  %v3641_v2 = vld [vmem:[#allocation2 + $0xcc] ss:$24 sps:$4 sm:$0xff]   ;;  %v3741_v3 = vld [vmem:[#allocation4 + $0x60] ss:$16 sps:$4 sm:$0xff]  }
  0xa4   :  { %736 = vmatpush1.bf16.msra.mxu0 %v3524_v4  ;;  %v3599_v4 = vld [vmem:[#allocation2 + $0x120] ss:$24 sps:$4 sm:$0xff]  }
  0xa5   :  { %746 = vmatprep.subr.bf16.mxu0 %v3531_v5  ;;  %v3600_v5 = vld [vmem:[#allocation2 + $0x154] ss:$24 sps:$4 sm:$0xff]   ;;  %1452 = vmatpush1.bf16.msra.mxu1 %v3599_v4  ;;  %v3639_v4 = vld [vmem:[#allocation2 + $0xc8] ss:$24 sps:$4 sm:$0xff]  }
  0xa6   :  { %1453 = vmatprep.subr.bf16.mxu1 %v3600_v5  ;;  %v3749_v5 = vld [vmem:[#allocation4 + $0x84] ss:$16 sps:$4 sm:$0xff]  }
  0xa7   :  { %738 = vmatmul.mubr.bf16.vlgmr.msra.gmra.mrb[0].mxu0 %v3005_v8  ;;  %v3605_v8 = vld [vmem:[#allocation2 + $0x180] ss:$24 sps:$4 sm:$0xff]  }
  0xa8   :  { %747 = vmatpush1.bf16.msra.mxu0 %v3529_v7  ;;  %778 = vmatprep.mubr.bf16.mxu0 %v3008_v10  ;;  %v3603_v7 = vld [vmem:[#allocation2 + $0x184] ss:$24 sps:$4 sm:$0xff]   ;;  %v3608_v10 = vld [vmem:[#allocation2 + $0x1b0] ss:$24 sps:$4 sm:$0xff]  }
  0xa9   :  { %748 = vmatprep.subr.bf16.mxu0 %v3534_v9  ;;  %1454 = vmatpush1.bf16.msra.mxu1 %v3602_v6  ;;  %v3606_v9 = vld [vmem:[#allocation2 + $0x1b4] ss:$24 sps:$4 sm:$0xff]  }
  0xaa   :  { %1455 = vmatprep.subr.bf16.mxu1 %v3603_v7  ;;  %v3644_v6 = vld [vmem:[#allocation2 + $0xfc] ss:$24 sps:$4 sm:$0xff]   ;;  %v3747_v7 = vld [vmem:[#allocation4 + $0x80] ss:$16 sps:$4 sm:$0xff]  }
  0xac   :  { %749 = vmatpush1.bf16.msra.mxu0 %v3532_v11  ;;  %v3609_v11 = vld [vmem:[#allocation2 + $0x1e4] ss:$24 sps:$4 sm:$0xff]  }
  0xad   :  { %750 = vmatprep.subr.bf16.mxu0 %v3537_v12  ;;  %1456 = vmatpush1.bf16.msra.mxu1 %v3605_v8  ;;  %v3642_v8 = vld [vmem:[#allocation2 + $0xf8] ss:$24 sps:$4 sm:$0xff]  }
  0xae   :  { %1457 = vmatprep.subr.bf16.mxu1 %v3606_v9  ;;  %v3755_v9 = vld [vmem:[#allocation4 + $0xa4] ss:$16 sps:$4 sm:$0xff]  }
  0xb0   :  { %751 = vmatpush1.bf16.msra.mxu0 %v3535_v13 }
  0xb1   :  { %752 = vmatprep.subr.bf16.mxu0 %v3540_v14  ;;  %1458 = vmatpush1.bf16.msra.mxu1 %v3608_v10  ;;  %v3647_v10 = vld [vmem:[#allocation2 + $0x12c] ss:$24 sps:$4 sm:$0xff]  }
  0xb2   :  { %1459 = vmatprep.subr.bf16.mxu1 %v3609_v11  ;;  %v3753_v11 = vld [vmem:[#allocation4 + $0xa0] ss:$16 sps:$4 sm:$0xff]  }
  0xb4   :  { %753 = vmatpush1.bf16.msra.mxu0 %v3538_v15 }
  0xb5   :  { %754 = vmatprep.subr.bf16.mxu0 %v3543_v16 }
  0xb8   :  { %755 = vmatpush1.bf16.msra.mxu0 %v3541_v17 }
  0xb9   :  { %756 = vmatprep.subr.bf16.mxu0 %v3546_v18 }
  0xbc   :  { %757 = vmatpush1.bf16.msra.mxu0 %v3544_v19  ;;  %v3611_v19 = vld [vmem:[#allocation2 + $0x1e0] ss:$24 sps:$4 sm:$0xff]  }
  0xbd   :  { %758 = vmatprep.subr.bf16.mxu0 %v3549_v20  ;;  %1460 = vmatpush1.bf16.msra.mxu1 %v3611_v19  ;;  %v3612_v20 = vld [vmem:[#allocation2 + $0x214] ss:$24 sps:$4 sm:$0xff]   ;;  %v3765_v19 = vld [vmem:[#allocation4 + $0xe0] ss:$16 sps:$4 sm:$0xff]  }
  0xbe   :  { %1461 = vmatprep.subr.bf16.mxu1 %v3612_v20  ;;  %v3651_v20 = vld [vmem:[#allocation2 + $0x188] ss:$24 sps:$4 sm:$0xff]  }
  0xc0   :  { %759 = vmatpush1.bf16.msra.mxu0 %v3547_v21  ;;  %v3614_v21 = vld [vmem:[#allocation2 + $0x210] ss:$24 sps:$4 sm:$0xff]  }
  0xc1   :  { %760 = vmatprep.subr.bf16.mxu0 %v3552_v22  ;;  %1462 = vmatpush1.bf16.msra.mxu1 %v3614_v21  ;;  %v3615_v22 = vld [vmem:[#allocation2 + $0x244] ss:$24 sps:$4 sm:$0xff]  }
  0xc2   :  { %1463 = vmatprep.subr.bf16.mxu1 %v3615_v22  ;;  %v3773_v21 = vld [vmem:[#allocation4 + $0x104] ss:$16 sps:$4 sm:$0xff]  }
  0xc3   :  { %v3656_v22 = vld [vmem:[#allocation2 + $0x1bc] ss:$24 sps:$4 sm:$0xff]  }
  0xc4   :  { %761 = vmatpush1.bf16.msra.mxu0 %v3550_v23  ;;  %v3617_v23 = vld [vmem:[#allocation2 + $0x240] ss:$24 sps:$4 sm:$0xff]  }
  0xc5   :  { %762 = vmatprep.subr.bf16.mxu0 %v3555_v24  ;;  %v3618_v24 = vld [vmem:[#allocation2 + $0x274] ss:$24 sps:$4 sm:$0xff]   ;;  %1464 = vmatpush1.bf16.msra.mxu1 %v3617_v23  ;;  %v3771_v23 = vld [vmem:[#allocation4 + $0x100] ss:$16 sps:$4 sm:$0xff]  }
  0xc6   :  { %1465 = vmatprep.subr.bf16.mxu1 %v3618_v24  ;;  %v3654_v24 = vld [vmem:[#allocation2 + $0x1b8] ss:$24 sps:$4 sm:$0xff]  }
  0xc8   :  { %763 = vmatpush1.bf16.msra.mxu0 %v3553_v25  ;;  %v3620_v25 = vld [vmem:[#allocation2 + $0x270] ss:$24 sps:$4 sm:$0xff]  }
  0xc9   :  { %764 = vmatprep.subr.bf16.mxu0 %v3558_v26  ;;  %v3621_v26 = vld [vmem:[#allocation2 + $0x2a4] ss:$24 sps:$4 sm:$0xff]   ;;  %1466 = vmatpush1.bf16.msra.mxu1 %v3620_v25 }
  0xca   :  { %1467 = vmatprep.subr.bf16.mxu1 %v3621_v26  ;;  %v3779_v25 = vld [vmem:[#allocation4 + $0x124] ss:$16 sps:$4 sm:$0xff]  }
  0xcb   :  { %v3659_v26 = vld [vmem:[#allocation2 + $0x1ec] ss:$24 sps:$4 sm:$0xff]  }
  0xcc   :  { %765 = vmatpush1.bf16.msra.mxu0 %v3556_v27  ;;  %v3623_v27 = vld [vmem:[#allocation2 + $0x2a0] ss:$24 sps:$4 sm:$0xff]  }
  0xcd   :  { %766 = vmatprep.subr.bf16.mxu0 %v3561_v28  ;;  %v3624_v28 = vld [vmem:[#allocation2 + $0x2d4] ss:$24 sps:$4 sm:$0xff]   ;;  %1468 = vmatpush1.bf16.msra.mxu1 %v3623_v27  ;;  %v3777_v27 = vld [vmem:[#allocation4 + $0x120] ss:$16 sps:$4 sm:$0xff]  }
  0xce   :  { %1469 = vmatprep.subr.bf16.mxu1 %v3624_v28  ;;  %v3657_v28 = vld [vmem:[#allocation2 + $0x1e8] ss:$24 sps:$4 sm:$0xff]  }
  0xd0   :  { %767 = vmatpush1.bf16.msra.mxu0 %v3559_v29  ;;  %v3626_v29 = vld [vmem:[#allocation2 + $0x2d0] ss:$24 sps:$4 sm:$0xff]  }
  0xd1   :  { %768 = vmatprep.subr.bf16.mxu0 %v3564_v30  ;;  %1470 = vmatpush1.bf16.msra.mxu1 %v3626_v29  ;;  %v3629_v30 = vld [vmem:[#allocation2 + $0xc] ss:$24 sps:$4 sm:$0xff]  }
  0xd2   :  { %1480 = vmatprep.subr.bf16.mxu1 %v3629_v30  ;;  %v3785_v29 = vld [vmem:[#allocation4 + $0x144] ss:$16 sps:$4 sm:$0xff]  }
  0xd3   :  { %v3662_v30 = vld [vmem:[#allocation2 + $0x21c] ss:$24 sps:$4 sm:$0xff]  }
  0xd4   :  { %769 = vmatpush1.bf16.msra.mxu0 %v3562_v31 }
  0xd5   :  { %770 = vmatprep.subr.bf16.mxu0 %v3567_v32 }
  0xd8   :  { %771 = vmatpush1.bf16.msra.mxu0 %v3565_v33 }
  0xd9   :  { %772 = vmatprep.subr.bf16.mxu0 %v3570_v34  ;;  %v49_v34 = vld [vmem:[%s4509_s4 + $0x2] sm:$0x3] }
  0xdc   :  { %773 = vmatpush1.bf16.msra.mxu0 %v3568_v35  ;;  %v50_v35 = vld [vmem:[%s4509_s4 + $0x4] sm:$0x3] }
  0xdd   :  { %774 = vmatprep.subr.bf16.mxu0 %v3573_v36  ;;  %v812_v36 = vrot.slane %v49_v34, %v4439_v45  ;;  %v821_v44 = vrot.slane %v50_v35, %v4433_v43 }
  0xe0   :  { %775 = vmatpush1.bf16.msra.mxu0 %v3571_v37  ;;  %v808_v37 = vrot.slane %v49_v34, %v4433_v43  ;;  %v3665_v34 = vld [vmem:[#allocation2 + $0x24c] ss:$24 sps:$4 sm:$0xff]  }
  0xe1   :  { %776 = vmatprep.subr.bf16.mxu0 %v3576_v38 }
  0xe4   :  { %777 = vmatpush1.bf16.msra.mxu0 %v3574_v39 }
  0xe5   :  { %2747 = vmatprep.subr.bf16.mxu0 %v3725_v55  ;;  %v3678_v55 = vld [vmem:[#allocation2 + $0x40] ss:$24 sps:$4 sm:$0xff]  }
  0xe7   :  { %779 = vmatmul.mubr.bf16.vlgmr.msra.gmra.mrb[0].mxu0 %v3007_v40  ;;  %v825_v40 = vrot.slane %v50_v35, %v4439_v45  ;;  %v3789_v35 = vld [vmem:[#allocation4 + $0x160] ss:$16 sps:$4 sm:$0xff]  }
 0x1ba   :  { %v780_v48 = vpop.f32.mrb[0].mxu0 }
 0x1bb   :  { %v3393_v49 = vadd.f32 %v780_v48, %v156_v46  ;;  %v782_v50 = vpop.f32.mrb[1].mxu0 }
 0x1bc   :  { %v3394_v51 = vadd.f32 %v782_v50, %v160_v47  ;;  %v784_v52 = vpop.f32.mrb[2].mxu0 }
 0x1bd   :  { %v785_v53 = vpop.f32.mrb[3].mxu0 }
 0x1be   :  { %v787_v54 = vadd.f32 %v3394_v51, %v3393_v49  ;;  %v3632_v53 = vld [vmem:[#allocation2 + $0x3c] ss:$24 sps:$4 sm:$0xff]  }
 0x1c0   :  { %788 = vadd.xlane.f32.xlu0 %v787_v54  ;;  %v3723_v54 = vld [vmem:[#allocation4] ss:$16 sps:$4 sm:$0xff]  }
 0x1c1   :  { %2748 = vmatpush1.bf16.msra.mxu0 %v3723_v54  ;;  %v3680_v54 = vld [vmem:[#allocation2 + $0x44] ss:$24 sps:$4 sm:$0xff]  }
 0x1c2   :  { %2749 = vmatprep.subr.bf16.mxu0 %v3731_v57  ;;  %v3681_v57 = vld [vmem:[#allocation2 + $0x70] ss:$24 sps:$4 sm:$0xff]  }
 0x1c5   :  { %2750 = vmatpush1.bf16.msra.mxu0 %v3729_v59  ;;  %v3684_v59 = vld [vmem:[#allocation2 + $0xa0] ss:$24 sps:$4 sm:$0xff]  }
 0x1c6   :  { %2751 = vmatprep.subr.bf16.mxu0 %v3737_v61  ;;  %v3687_v61 = vld [vmem:[#allocation2 + $0xd0] ss:$24 sps:$4 sm:$0xff]  }
 0x1c9   :  { %2752 = vmatpush1.bf16.msra.mxu0 %v3735_v63  ;;  %v3690_v63 = vld [vmem:[#allocation2 + $0x100] ss:$24 sps:$4 sm:$0xff]  }
 0x1ca   :  { %2753 = vmatprep.subr.bf16.mxu0 %v3743_v1  ;;  %v3807_v1 = vld [vmem:[#allocation4 + $0x1c0] ss:$16 sps:$4 sm:$0xff]  }
 0x1cd   :  { %2754 = vmatpush1.bf16.msra.mxu0 %v3741_v3  ;;  %v3698_v3 = vld [vmem:[#allocation2 + $0x164] ss:$24 sps:$4 sm:$0xff]  }
 0x1ce   :  { %2755 = vmatprep.subr.bf16.mxu0 %v3749_v5  ;;  %v3813_v5 = vld [vmem:[#allocation4 + $0x1e0] ss:$16 sps:$4 sm:$0xff]  }
 0x1d1   :  { %2756 = vmatpush1.bf16.msra.mxu0 %v3747_v7  ;;  %v3701_v7 = vld [vmem:[#allocation2 + $0x194] ss:$24 sps:$4 sm:$0xff]  }
 0x1d2   :  { %2757 = vmatprep.subr.bf16.mxu0 %v3755_v9  ;;  %v3699_v9 = vld [vmem:[#allocation2 + $0x190] ss:$24 sps:$4 sm:$0xff]  }
 0x1d5   :  { %2758 = vmatpush1.bf16.msra.mxu0 %v3753_v11  ;;  %v3702_v11 = vld [vmem:[#allocation2 + $0x1c0] ss:$24 sps:$4 sm:$0xff]  }
 0x24d   :  { %v789_v12 = vpop.xlane.xlu0 %788 }
 0x24e   :  { %v791_v13 = vmul.f32 0.00390625, %v789_v12  ;;  %v3645_v12 = vld [vmem:[#allocation2 + $0x128] ss:$24 sps:$4 sm:$0xff]  }
 0x250   :  { %v792_v14 = vsub.f32 %v3393_v49, %v791_v13  ;;  %v793_v15 = vsub.f32 %v3394_v51, %v791_v13  ;;  %v3627_v51 = vld [vmem:[#allocation2 + $0x8] ss:$24 sps:$4 sm:$0xff]   ;;  %v3761_v13 = vld [vmem:[#allocation4 + $0xc4] ss:$16 sps:$4 sm:$0xff]  }
 0x251   :  { %2759 = vmatprep.subr.bf16.mxu0 %v3761_v13  ;;  %v3705_v13 = vld [vmem:[#allocation2 + $0x1f0] ss:$24 sps:$4 sm:$0xff]  }
 0x252   :  { %v794_v16 = vmul.f32 %v792_v14, %v792_v14  ;;  %v795_v17 = vmul.f32 %v793_v15, %v793_v15 }
 0x254   :  { %v796_v18 = vadd.f32 %v795_v17, %v794_v16  ;;  %v3648_v16 = vld [vmem:[#allocation2 + $0x158] ss:$24 sps:$4 sm:$0xff]   ;;  %v3767_v17 = vld [vmem:[#allocation4 + $0xe4] ss:$16 sps:$4 sm:$0xff]  }
 0x256   :  { %797 = vadd.xlane.f32.xlu0 %v796_v18  ;;  %v3653_v18 = vld [vmem:[#allocation2 + $0x18c] ss:$24 sps:$4 sm:$0xff]  }
 0x2e3   :  { %v798_v31 = vpop.xlane.xlu0 %797 }
 0x2e4   :  { %v799_v32 = vmul.f32 0.00390625, %v798_v31  ;;  %v3783_v31 = vld [vmem:[#allocation4 + $0x140] ss:$16 sps:$4 sm:$0xff]  }
 0x2e6   :  { %v800_v33 = vadd.f32 1e-05, %v799_v32  ;;  %v3660_v32 = vld [vmem:[#allocation2 + $0x218] ss:$24 sps:$4 sm:$0xff]  }
 0x2e8   :  { %4011 = vrsqrt.f32 %v800_v33  ;;  %v3791_v33 = vld [vmem:[#allocation4 + $0x164] ss:$16 sps:$4 sm:$0xff]  }
 0x2f2   :  { %v4012_v38 = vpop.eup %4011 }
 0x2f3   :  { %v803_v39 = vmul.f32 %v4012_v38, %v793_v15  ;;  %v802_v41 = vmul.f32 %v4012_v38, %v792_v14  ;;  %v3650_v14 = vld [vmem:[#allocation2 + $0x15c] ss:$24 sps:$4 sm:$0xff]   ;;  %v3759_v15 = vld [vmem:[#allocation4 + $0xc0] ss:$16 sps:$4 sm:$0xff]  }
 0x2f4   :  { %2760 = vmatpush1.bf16.msra.mxu0 %v3759_v15  ;;  %v3668_v38 = vld [vmem:[#allocation2 + $0x27c] ss:$24 sps:$4 sm:$0xff]   ;;  %v3708_v15 = vld [vmem:[#allocation2 + $0x220] ss:$24 sps:$4 sm:$0xff]  }
 0x2f5   :  { %v816_v46 = vmul.f32 %v812_v36, %v803_v39  ;;  %v815_v47 = vmul.f32 %v808_v37, %v802_v41  ;;  %2761 = vmatprep.subr.bf16.mxu0 %v3767_v17  ;;  %v3663_v36 = vld [vmem:[#allocation2 + $0x248] ss:$24 sps:$4 sm:$0xff]   ;;  %v3797_v37 = vld [vmem:[#allocation4 + $0x184] ss:$16 sps:$4 sm:$0xff]  }
 0x2f6   :  { %v3795_v39 = vld [vmem:[#allocation4 + $0x180] ss:$16 sps:$4 sm:$0xff]   ;;  %v3803_v41 = vld [vmem:[#allocation4 + $0x1a4] ss:$16 sps:$4 sm:$0xff]  }
 0x2f7   :  { %v829_v48 = vadd.f32 %v825_v40, %v816_v46  ;;  %v828_v49 = vadd.f32 %v821_v44, %v815_v47  ;;  %v3666_v40 = vld [vmem:[#allocation2 + $0x278] ss:$24 sps:$4 sm:$0xff]   ;;  %v3671_v44 = vld [vmem:[#allocation2 + $0x2ac] ss:$24 sps:$4 sm:$0xff]   ;;  %v3669_v47 = vld [vmem:[#allocation2 + $0x2a8] ss:$24 sps:$4 sm:$0xff]  }
 0x2f8   :  { %2762 = vmatpush1.bf16.msra.mxu0 %v3765_v19  ;;  %v3801_v46 = vld [vmem:[#allocation4 + $0x1a0] ss:$16 sps:$4 sm:$0xff]  }
 0x2f9   :  { %v4453_v50 = vpack.c.bf16 %v829_v48, %v829_v48  ;;  %v4455_v52 = vpack.c.bf16 %v828_v49, %v828_v49  ;;  %2763 = vmatprep.subr.bf16.mxu0 %v3773_v21  ;;  %v3674_v48 = vld [vmem:[#allocation2 + $0x2dc] ss:$24 sps:$4 sm:$0xff]   ;;  %v3672_v49 = vld [vmem:[#allocation2 + $0x2d8] ss:$24 sps:$4 sm:$0xff]  }
 0x2fa   :  { %v3711_v17 = vld [vmem:[#allocation2 + $0x250] ss:$24 sps:$4 sm:$0xff]   ;;  %v3714_v19 = vld [vmem:[#allocation2 + $0x280] ss:$24 sps:$4 sm:$0xff]  }
 0x2fb   :  { %1471 = vmatprep.mubr.bf16.mxu1 %v4453_v50  ;;  %v3717_v21 = vld [vmem:[#allocation2 + $0x2b0] ss:$24 sps:$4 sm:$0xff]  }
 0x2fc   :  { %1472 = vmatmul.mubr.bf16.vlgmr.msra.gmra.mrb[0].mxu1 %v4455_v52  ;;  %2764 = vmatpush1.bf16.msra.mxu0 %v3771_v23  ;;  %v3720_v23 = vld [vmem:[#allocation2 + $0x2e0] ss:$24 sps:$4 sm:$0xff]  }
 0x2fd   :  { %1481 = vmatpush1.bf16.msra.mxu1 %v3627_v51  ;;  %1512 = vmatprep.mubr.bf16.mxu1 %v4453_v50  ;;  %v3677_v51 = vld [vmem:[#allocation2 + $0x14] ss:$24 sps:$4 sm:$0xff]  }
 0x2fe   :  { %1482 = vmatprep.subr.bf16.mxu1 %v3632_v53  ;;  %2765 = vmatprep.subr.bf16.mxu0 %v3779_v25  ;;  %v3675_v53 = vld [vmem:[#allocation2 + $0x10] ss:$24 sps:$4 sm:$0xff]  }
 0x2ff   :  { %v3726_v25 = vld [vmem:[#allocation4 + $0x8] ss:$16 sps:$4 sm:$0xff]  }
 0x300   :  { %2766 = vmatpush1.bf16.msra.mxu0 %v3777_v27  ;;  %v3732_v27 = vld [vmem:[#allocation4 + $0x28] ss:$16 sps:$4 sm:$0xff]  }
 0x301   :  { %1483 = vmatpush1.bf16.msra.mxu1 %v3630_v56  ;;  %2767 = vmatprep.subr.bf16.mxu0 %v3785_v29  ;;  %v3683_v56 = vld [vmem:[#allocation2 + $0x74] ss:$24 sps:$4 sm:$0xff]   ;;  %v3738_v29 = vld [vmem:[#allocation4 + $0x48] ss:$16 sps:$4 sm:$0xff]  }
 0x302   :  { %1484 = vmatprep.subr.bf16.mxu1 %v3635_v58  ;;  %v3686_v58 = vld [vmem:[#allocation2 + $0xa4] ss:$24 sps:$4 sm:$0xff]  }
 0x304   :  { %2768 = vmatpush1.bf16.msra.mxu0 %v3783_v31  ;;  %v3744_v31 = vld [vmem:[#allocation4 + $0x68] ss:$16 sps:$4 sm:$0xff]  }
 0x305   :  { %1485 = vmatpush1.bf16.msra.mxu1 %v3633_v60  ;;  %2769 = vmatprep.subr.bf16.mxu0 %v3791_v33  ;;  %v3689_v60 = vld [vmem:[#allocation2 + $0xd4] ss:$24 sps:$4 sm:$0xff]   ;;  %v3750_v33 = vld [vmem:[#allocation4 + $0x88] ss:$16 sps:$4 sm:$0xff]  }
 0x306   :  { %1486 = vmatprep.subr.bf16.mxu1 %v3638_v62  ;;  %v3692_v62 = vld [vmem:[#allocation2 + $0x104] ss:$24 sps:$4 sm:$0xff]  }
 0x308   :  { %2770 = vmatpush1.bf16.msra.mxu0 %v3789_v35  ;;  %v3756_v35 = vld [vmem:[#allocation4 + $0xa8] ss:$16 sps:$4 sm:$0xff]  }
 0x309   :  { %1487 = vmatpush1.bf16.msra.mxu1 %v3636_v0  ;;  %2771 = vmatprep.subr.bf16.mxu0 %v3797_v37  ;;  %v3695_v0 = vld [vmem:[#allocation2 + $0x134] ss:$24 sps:$4 sm:$0xff]  }
 0x30a   :  { %1488 = vmatprep.subr.bf16.mxu1 %v3641_v2  ;;  %v3693_v2 = vld [vmem:[#allocation2 + $0x130] ss:$24 sps:$4 sm:$0xff]   ;;  %v3770_v37 = vld [vmem:[#allocation4 + $0xec] ss:$16 sps:$4 sm:$0xff]  }
 0x30c   :  { %2772 = vmatpush1.bf16.msra.mxu0 %v3795_v39  ;;  %v3776_v39 = vld [vmem:[#allocation4 + $0x10c] ss:$16 sps:$4 sm:$0xff]  }
 0x30d   :  { %1489 = vmatpush1.bf16.msra.mxu1 %v3639_v4  ;;  %2773 = vmatprep.subr.bf16.mxu0 %v3803_v41  ;;  %v3815_v4 = vld [vmem:[#allocation4 + $0x1e4] ss:$16 sps:$4 sm:$0xff]   ;;  %v3782_v41 = vld [vmem:[#allocation4 + $0x12c] ss:$16 sps:$4 sm:$0xff]  }
 0x30e   :  { %1490 = vmatprep.subr.bf16.mxu1 %v3644_v6  ;;  %v3696_v6 = vld [vmem:[#allocation2 + $0x160] ss:$24 sps:$4 sm:$0xff]  }
 0x310   :  { %2774 = vmatpush1.bf16.msra.mxu0 %v3801_v46  ;;  %v3788_v46 = vld [vmem:[#allocation4 + $0x14c] ss:$16 sps:$4 sm:$0xff]  }
 0x311   :  { %1491 = vmatpush1.bf16.msra.mxu1 %v3642_v8  ;;  %v3821_v8 = vld [vmem:[#allocation4 + $0x204] ss:$16 sps:$4 sm:$0xff]  }
 0x312   :  { %1492 = vmatprep.subr.bf16.mxu1 %v3647_v10  ;;  %v3704_v10 = vld [vmem:[#allocation2 + $0x1c4] ss:$24 sps:$4 sm:$0xff]  }
 0x315   :  { %1493 = vmatpush1.bf16.msra.mxu1 %v3645_v12  ;;  %v3707_v12 = vld [vmem:[#allocation2 + $0x1f4] ss:$24 sps:$4 sm:$0xff]  }
 0x316   :  { %1494 = vmatprep.subr.bf16.mxu1 %v3650_v14  ;;  %v3710_v14 = vld [vmem:[#allocation2 + $0x224] ss:$24 sps:$4 sm:$0xff]  }
 0x319   :  { %1495 = vmatpush1.bf16.msra.mxu1 %v3648_v16  ;;  %v3713_v16 = vld [vmem:[#allocation2 + $0x254] ss:$24 sps:$4 sm:$0xff]  }
 0x31a   :  { %1496 = vmatprep.subr.bf16.mxu1 %v3653_v18  ;;  %v3716_v18 = vld [vmem:[#allocation2 + $0x284] ss:$24 sps:$4 sm:$0xff]  }
 0x31d   :  { %1497 = vmatpush1.bf16.msra.mxu1 %v3651_v20  ;;  %v3719_v20 = vld [vmem:[#allocation2 + $0x2b4] ss:$24 sps:$4 sm:$0xff]  }
 0x31e   :  { %1498 = vmatprep.subr.bf16.mxu1 %v3656_v22  ;;  %v3722_v22 = vld [vmem:[#allocation2 + $0x2e4] ss:$24 sps:$4 sm:$0xff]  }
 0x321   :  { %1499 = vmatpush1.bf16.msra.mxu1 %v3654_v24  ;;  %v3728_v24 = vld [vmem:[#allocation4 + $0xc] ss:$16 sps:$4 sm:$0xff]  }
 0x322   :  { %1500 = vmatprep.subr.bf16.mxu1 %v3659_v26  ;;  %v3734_v26 = vld [vmem:[#allocation4 + $0x2c] ss:$16 sps:$4 sm:$0xff]  }
 0x325   :  { %1501 = vmatpush1.bf16.msra.mxu1 %v3657_v28  ;;  %v3740_v28 = vld [vmem:[#allocation4 + $0x4c] ss:$16 sps:$4 sm:$0xff]  }
 0x326   :  { %1502 = vmatprep.subr.bf16.mxu1 %v3662_v30  ;;  %v3746_v30 = vld [vmem:[#allocation4 + $0x6c] ss:$16 sps:$4 sm:$0xff]  }
 0x329   :  { %1503 = vmatpush1.bf16.msra.mxu1 %v3660_v32  ;;  %v3752_v32 = vld [vmem:[#allocation4 + $0x8c] ss:$16 sps:$4 sm:$0xff]  }
 0x32a   :  { %1504 = vmatprep.subr.bf16.mxu1 %v3665_v34  ;;  %v3758_v34 = vld [vmem:[#allocation4 + $0xac] ss:$16 sps:$4 sm:$0xff]  }
 0x32d   :  { %1505 = vmatpush1.bf16.msra.mxu1 %v3663_v36  ;;  %v3762_v36 = vld [vmem:[#allocation4 + $0xc8] ss:$16 sps:$4 sm:$0xff]  }
 0x32e   :  { %1506 = vmatprep.subr.bf16.mxu1 %v3668_v38  ;;  %v3768_v38 = vld [vmem:[#allocation4 + $0xe8] ss:$16 sps:$4 sm:$0xff]  }
 0x331   :  { %1507 = vmatpush1.bf16.msra.mxu1 %v3666_v40  ;;  %v3774_v40 = vld [vmem:[#allocation4 + $0x108] ss:$16 sps:$4 sm:$0xff]  }
 0x332   :  { %1508 = vmatprep.subr.bf16.mxu1 %v3671_v44  ;;  %v3780_v44 = vld [vmem:[#allocation4 + $0x128] ss:$16 sps:$4 sm:$0xff]  }
 0x335   :  { %1509 = vmatpush1.bf16.msra.mxu1 %v3669_v47  ;;  %v3786_v47 = vld [vmem:[#allocation4 + $0x148] ss:$16 sps:$4 sm:$0xff]  }
 0x336   :  { %1510 = vmatprep.subr.bf16.mxu1 %v3674_v48  ;;  %v3794_v48 = vld [vmem:[#allocation4 + $0x16c] ss:$16 sps:$4 sm:$0xff]  }
 0x339   :  { %1511 = vmatpush1.bf16.msra.mxu1 %v3672_v49  ;;  %v3792_v49 = vld [vmem:[#allocation4 + $0x168] ss:$16 sps:$4 sm:$0xff]  }
 0x33a   :  { %1521 = vmatprep.subr.bf16.mxu1 %v3677_v51  ;;  %v3800_v51 = vld [vmem:[#allocation4 + $0x18c] ss:$16 sps:$4 sm:$0xff]  }
 0x33c   :  { %1513 = vmatmul.mubr.bf16.vlgmr.msra.gmra.mrb[4].mxu1 %v4455_v52 }
 0x33d   :  { %1522 = vmatpush1.bf16.msra.mxu1 %v3675_v53  ;;  %1553 = vmatprep.mubr.bf16.mxu1 %v4453_v50  ;;  %v3809_v50 = vld [vmem:[#allocation4 + $0x1c4] ss:$16 sps:$4 sm:$0xff]   ;;  %v3798_v53 = vld [vmem:[#allocation4 + $0x188] ss:$16 sps:$4 sm:$0xff]  }
 0x33e   :  { %1523 = vmatprep.subr.bf16.mxu1 %v3680_v54  ;;  %2775 = vmatprep.subr.bf16.mxu0 %v3809_v50  ;;  %v3806_v54 = vld [vmem:[#allocation4 + $0x1ac] ss:$16 sps:$4 sm:$0xff]  }
 0x33f   :  { %2776 = vmatpush1.bf16.msra.mxu0 %v3807_v1 }
 0x340   :  { %2777 = vmatprep.subr.bf16.mxu0 %v3815_v4 }
 0x341   :  { %1524 = vmatpush1.bf16.msra.mxu1 %v3678_v55  ;;  %v3804_v55 = vld [vmem:[#allocation4 + $0x1a8] ss:$16 sps:$4 sm:$0xff]  }
 0x342   :  { %1525 = vmatprep.subr.bf16.mxu1 %v3683_v56  ;;  %v3812_v56 = vld [vmem:[#allocation4 + $0x1cc] ss:$16 sps:$4 sm:$0xff]  }
 0x343   :  { %2778 = vmatpush1.bf16.msra.mxu0 %v3813_v5 }
 0x344   :  { %2788 = vmatprep.subr.bf16.mxu0 %v3821_v8  ;;  %v3819_v8 = vld [vmem:[#allocation4 + $0x200] ss:$16 sps:$4 sm:$0xff]  }
 0x345   :  { %1526 = vmatpush1.bf16.msra.mxu1 %v3681_v57  ;;  %v3810_v57 = vld [vmem:[#allocation4 + $0x1c8] ss:$16 sps:$4 sm:$0xff]  }
 0x346   :  { %1527 = vmatprep.subr.bf16.mxu1 %v3686_v58  ;;  %v3818_v58 = vld [vmem:[#allocation4 + $0x1ec] ss:$16 sps:$4 sm:$0xff]  }
 0x349   :  { %1528 = vmatpush1.bf16.msra.mxu1 %v3684_v59  ;;  %v3816_v59 = vld [vmem:[#allocation4 + $0x1e8] ss:$16 sps:$4 sm:$0xff]  }
 0x34a   :  { %1529 = vmatprep.subr.bf16.mxu1 %v3689_v60  ;;  %v3824_v60 = vld [vmem:[#allocation4 + $0x20c] ss:$16 sps:$4 sm:$0xff]  }
 0x34d   :  { %1530 = vmatpush1.bf16.msra.mxu1 %v3687_v61  ;;  %v4466_v61 = vld [vmem:[%s4509_s4 + $0x6] sm:$0x3f] }
 0x34e   :  { %1531 = vmatprep.subr.bf16.mxu1 %v3692_v62  ;;  %v932_v62 = vrot.slane %v4466_v61, %v4433_v43 }
 0x351   :  { %1532 = vmatpush1.bf16.msra.mxu1 %v3690_v63  ;;  %v936_v63 = vrot.slane %v4466_v61, %v4439_v45 }
 0x352   :  { %1533 = vmatprep.subr.bf16.mxu1 %v3695_v0 }
 0x355   :  { %1534 = vmatpush1.bf16.msra.mxu1 %v3693_v2 }
 0x356   :  { %1535 = vmatprep.subr.bf16.mxu1 %v3698_v3 }
 0x359   :  { %1536 = vmatpush1.bf16.msra.mxu1 %v3696_v6 }
 0x35a   :  { %1537 = vmatprep.subr.bf16.mxu1 %v3701_v7 }
 0x35d   :  { %1538 = vmatpush1.bf16.msra.mxu1 %v3699_v9  ;;  %v3822_v9 = vld [vmem:[#allocation4 + $0x208] ss:$16 sps:$4 sm:$0xff]  }
 0x35e   :  { %1539 = vmatprep.subr.bf16.mxu1 %v3704_v10 }
 0x361   :  { %1540 = vmatpush1.bf16.msra.mxu1 %v3702_v11  ;;  %v3827_v11 = vld [vmem:[#allocation4 + $0x224] ss:$16 sps:$4 sm:$0xff]  }
 0x362   :  { %1541 = vmatprep.subr.bf16.mxu1 %v3707_v12  ;;  %v3830_v12 = vld [vmem:[#allocation4 + $0x22c] ss:$16 sps:$4 sm:$0xff]  }
 0x365   :  { %1542 = vmatpush1.bf16.msra.mxu1 %v3705_v13  ;;  %v3825_v13 = vld [vmem:[#allocation4 + $0x220] ss:$16 sps:$4 sm:$0xff]  }
 0x366   :  { %1543 = vmatprep.subr.bf16.mxu1 %v3710_v14  ;;  %v3828_v14 = vld [vmem:[#allocation4 + $0x228] ss:$16 sps:$4 sm:$0xff]  }
 0x369   :  { %1544 = vmatpush1.bf16.msra.mxu1 %v3708_v15  ;;  %v3833_v15 = vld [vmem:[#allocation4 + $0x244] ss:$16 sps:$4 sm:$0xff]  }
 0x36a   :  { %1545 = vmatprep.subr.bf16.mxu1 %v3713_v16  ;;  %v3836_v16 = vld [vmem:[#allocation4 + $0x24c] ss:$16 sps:$4 sm:$0xff]  }
 0x36d   :  { %1546 = vmatpush1.bf16.msra.mxu1 %v3711_v17  ;;  %v3831_v17 = vld [vmem:[#allocation4 + $0x240] ss:$16 sps:$4 sm:$0xff]  }
 0x36e   :  { %1547 = vmatprep.subr.bf16.mxu1 %v3716_v18  ;;  %v3834_v18 = vld [vmem:[#allocation4 + $0x248] ss:$16 sps:$4 sm:$0xff]  }
 0x371   :  { %1548 = vmatpush1.bf16.msra.mxu1 %v3714_v19  ;;  %v3839_v19 = vld [vmem:[#allocation4 + $0x264] ss:$16 sps:$4 sm:$0xff]  }
 0x372   :  { %1549 = vmatprep.subr.bf16.mxu1 %v3719_v20  ;;  %v3842_v20 = vld [vmem:[#allocation4 + $0x26c] ss:$16 sps:$4 sm:$0xff]  }
 0x375   :  { %1550 = vmatpush1.bf16.msra.mxu1 %v3717_v21  ;;  %v3837_v21 = vld [vmem:[#allocation4 + $0x260] ss:$16 sps:$4 sm:$0xff]  }
 0x376   :  { %1551 = vmatprep.subr.bf16.mxu1 %v3722_v22  ;;  %v3840_v22 = vld [vmem:[#allocation4 + $0x268] ss:$16 sps:$4 sm:$0xff]  }
 0x379   :  { %1552 = vmatpush1.bf16.msra.mxu1 %v3720_v23  ;;  %v3845_v23 = vld [vmem:[#allocation4 + $0x284] ss:$16 sps:$4 sm:$0xff]  }
 0x37a   :  { %2870 = vmatprep.subr.bf16.mxu1 %v3728_v24  ;;  %v3848_v24 = vld [vmem:[#allocation4 + $0x28c] ss:$16 sps:$4 sm:$0xff]  }
 0x37c   :  { %1554 = vmatmul.mubr.bf16.vlgmr.msra.gmra.mrb[8].mxu1 %v4455_v52  ;;  %v3764_v52 = vld [vmem:[#allocation4 + $0xcc] ss:$16 sps:$4 sm:$0xff]  }
 0x37d   :  { %2871 = vmatpush1.bf16.msra.mxu1 %v3726_v25  ;;  %v3843_v25 = vld [vmem:[#allocation4 + $0x280] ss:$16 sps:$4 sm:$0xff]  }
 0x37e   :  { %2872 = vmatprep.subr.bf16.mxu1 %v3734_v26  ;;  %v3846_v26 = vld [vmem:[#allocation4 + $0x288] ss:$16 sps:$4 sm:$0xff]  }
 0x381   :  { %2873 = vmatpush1.bf16.msra.mxu1 %v3732_v27  ;;  %v3851_v27 = vld [vmem:[#allocation4 + $0x2a4] ss:$16 sps:$4 sm:$0xff]  }
 0x382   :  { %2874 = vmatprep.subr.bf16.mxu1 %v3740_v28  ;;  %v3854_v28 = vld [vmem:[#allocation4 + $0x2ac] ss:$16 sps:$4 sm:$0xff]  }
 0x385   :  { %2875 = vmatpush1.bf16.msra.mxu1 %v3738_v29  ;;  %v3849_v29 = vld [vmem:[#allocation4 + $0x2a0] ss:$16 sps:$4 sm:$0xff]  }
 0x386   :  { %2876 = vmatprep.subr.bf16.mxu1 %v3746_v30  ;;  %v3852_v30 = vld [vmem:[#allocation4 + $0x2a8] ss:$16 sps:$4 sm:$0xff]  }
 0x389   :  { %2877 = vmatpush1.bf16.msra.mxu1 %v3744_v31  ;;  %v3857_v31 = vld [vmem:[#allocation4 + $0x2c4] ss:$16 sps:$4 sm:$0xff]  }
 0x38a   :  { %2878 = vmatprep.subr.bf16.mxu1 %v3752_v32  ;;  %v3860_v32 = vld [vmem:[#allocation4 + $0x2cc] ss:$16 sps:$4 sm:$0xff]  }
 0x38d   :  { %2879 = vmatpush1.bf16.msra.mxu1 %v3750_v33  ;;  %v3855_v33 = vld [vmem:[#allocation4 + $0x2c0] ss:$16 sps:$4 sm:$0xff]  }
 0x38e   :  { %2880 = vmatprep.subr.bf16.mxu1 %v3758_v34  ;;  %v3858_v34 = vld [vmem:[#allocation4 + $0x2c8] ss:$16 sps:$4 sm:$0xff]  }
 0x391   :  { %2881 = vmatpush1.bf16.msra.mxu1 %v3756_v35  ;;  %v3863_v35 = vld [vmem:[#allocation4 + $0x2e4] ss:$16 sps:$4 sm:$0xff]  }
 0x392   :  { %2882 = vmatprep.subr.bf16.mxu1 %v3764_v52  ;;  %v3866_v52 = vld [vmem:[#allocation4 + $0x2ec] ss:$16 sps:$4 sm:$0xff]  }
 0x395   :  { %2883 = vmatpush1.bf16.msra.mxu1 %v3762_v36  ;;  %v3861_v36 = vld [vmem:[#allocation4 + $0x2e0] ss:$16 sps:$4 sm:$0xff]  }
 0x396   :  { %2884 = vmatprep.subr.bf16.mxu1 %v3770_v37  ;;  %v3864_v37 = vld [vmem:[#allocation4 + $0x2e8] ss:$16 sps:$4 sm:$0xff]  }
 0x399   :  { %2885 = vmatpush1.bf16.msra.mxu1 %v3768_v38  ;;  %v3869_v38 = vld [vmem:[#allocation4 + $0x304] ss:$16 sps:$4 sm:$0xff]  }
 0x39a   :  { %2886 = vmatprep.subr.bf16.mxu1 %v3776_v39  ;;  %v3872_v39 = vld [vmem:[#allocation4 + $0x30c] ss:$16 sps:$4 sm:$0xff]  }
 0x39d   :  { %2887 = vmatpush1.bf16.msra.mxu1 %v3774_v40  ;;  %v3867_v40 = vld [vmem:[#allocation4 + $0x300] ss:$16 sps:$4 sm:$0xff]  }
 0x39e   :  { %2888 = vmatprep.subr.bf16.mxu1 %v3782_v41  ;;  %v3870_v41 = vld [vmem:[#allocation4 + $0x308] ss:$16 sps:$4 sm:$0xff]  }
 0x3a1   :  { %2889 = vmatpush1.bf16.msra.mxu1 %v3780_v44  ;;  %v3875_v44 = vld [vmem:[#allocation4 + $0x324] ss:$16 sps:$4 sm:$0xff]  }
 0x3a2   :  { %2890 = vmatprep.subr.bf16.mxu1 %v3788_v46  ;;  %v3878_v46 = vld [vmem:[#allocation4 + $0x32c] ss:$16 sps:$4 sm:$0xff]  }
 0x3a5   :  { %2891 = vmatpush1.bf16.msra.mxu1 %v3786_v47  ;;  %v3873_v47 = vld [vmem:[#allocation4 + $0x320] ss:$16 sps:$4 sm:$0xff]  }
 0x3a6   :  { %2892 = vmatprep.subr.bf16.mxu1 %v3794_v48  ;;  %v3876_v48 = vld [vmem:[#allocation4 + $0x328] ss:$16 sps:$4 sm:$0xff]  }
 0x3a9   :  { %2893 = vmatpush1.bf16.msra.mxu1 %v3792_v49  ;;  %v3881_v49 = vld [vmem:[#allocation4 + $0x344] ss:$16 sps:$4 sm:$0xff]  }
 0x3aa   :  { %2894 = vmatprep.subr.bf16.mxu1 %v3800_v51  ;;  %v3884_v51 = vld [vmem:[#allocation4 + $0x34c] ss:$16 sps:$4 sm:$0xff]  }
 0x3ad   :  { %2895 = vmatpush1.bf16.msra.mxu1 %v3798_v53  ;;  %v3879_v53 = vld [vmem:[#allocation4 + $0x340] ss:$16 sps:$4 sm:$0xff]  }
 0x3ae   :  { %2896 = vmatprep.subr.bf16.mxu1 %v3806_v54  ;;  %v3882_v54 = vld [vmem:[#allocation4 + $0x348] ss:$16 sps:$4 sm:$0xff]  }
 0x3b1   :  { %2897 = vmatpush1.bf16.msra.mxu1 %v3804_v55  ;;  %v3887_v55 = vld [vmem:[#allocation4 + $0x364] ss:$16 sps:$4 sm:$0xff]  }
 0x3b2   :  { %2898 = vmatprep.subr.bf16.mxu1 %v3812_v56  ;;  %v3890_v56 = vld [vmem:[#allocation4 + $0x36c] ss:$16 sps:$4 sm:$0xff]  }
 0x3b5   :  { %2899 = vmatpush1.bf16.msra.mxu1 %v3810_v57  ;;  %v3885_v57 = vld [vmem:[#allocation4 + $0x360] ss:$16 sps:$4 sm:$0xff]  }
 0x3b6   :  { %2900 = vmatprep.subr.bf16.mxu1 %v3818_v58  ;;  %v3888_v58 = vld [vmem:[#allocation4 + $0x368] ss:$16 sps:$4 sm:$0xff]  }
 0x3b9   :  { %2901 = vmatpush1.bf16.msra.mxu1 %v3816_v59  ;;  %v3893_v59 = vld [vmem:[#allocation4 + $0x384] ss:$16 sps:$4 sm:$0xff]  }
 0x3ba   :  { %2911 = vmatprep.subr.bf16.mxu1 %v3824_v60  ;;  %v3896_v60 = vld [vmem:[#allocation4 + $0x38c] ss:$16 sps:$4 sm:$0xff]  }
 0x3cf   :  { %v1473_v0 = vpop.f32.mrb[0].mxu1 }
 0x3d0   :  { %v1474_v50 = vadd.f32 %v1473_v0, %v932_v62  ;;  %v1475_v1 = vpop.f32.mrb[1].mxu1  ;;  %v3891_v62 = vld [vmem:[#allocation4 + $0x380] ss:$16 sps:$4 sm:$0xff]   ;;  %v3899_v0 = vld [vmem:[#allocation4 + $0x3a4] ss:$16 sps:$4 sm:$0xff]  }
 0x3d1   :  { %v1476_v2 = vadd.f32 %v1475_v1, %v936_v63  ;;  %v1477_v3 = vpop.f32.mrb[2].mxu1  ;;  %v3894_v63 = vld [vmem:[#allocation4 + $0x388] ss:$16 sps:$4 sm:$0xff]   ;;  %v939_v1 = vsub.s32 2, %v4430_v42 }
 0x3d2   :  { %v1562_v4 = vmax.f32 %v1474_v50, 0.0  ;;  %v1478_v5 = vpop.f32.mrb[3].mxu1  ;;  %v3902_v50 = vld [vmem:[#allocation4 + $0x3ac] ss:$16 sps:$4 sm:$0xff]   ;;  %v3900_v3 = vld [vmem:[#allocation4 + $0x3a8] ss:$16 sps:$4 sm:$0xff]  }
 0x3d3   :  { %v1563_v6 = vmax.f32 %v1476_v2, 0.0  ;;  %v3897_v2 = vld [vmem:[#allocation4 + $0x3a0] ss:$16 sps:$4 sm:$0xff]   ;;  %v3905_v5 = vld [vmem:[#allocation4 + $0x3c4] ss:$16 sps:$4 sm:$0xff]  }
 0x3d4   :  { %v1568_v10 = vpack.c.bf16 %v1562_v4, %v1562_v4  ;;  %v943_v4 = vsub.s32 3, %v4430_v42 }
 0x3d5   :  { %v1569_v7 = vpack.c.bf16 %v1563_v6, %v1563_v6  ;;  %v3908_v6 = vld [vmem:[#allocation4 + $0x3cc] ss:$16 sps:$4 sm:$0xff]  }
 0x3d7   :  { %2779 = vmatprep.mubr.bf16.mxu0 %v1569_v7  ;;  %2902 = vmatprep.mubr.bf16.mxu1 %v1569_v7  ;;  %v940_v7 = vrot.slane %v4466_v61, %v939_v1 }
 0x3d8   :  { %2780 = vmatmul.mubr.bf16.vlgmr.msra.gmra.mrb[4].mxu0 %v1568_v10  ;;  %2903 = vmatmul.mubr.bf16.vlgmr.msra.gmra.mrb[12].mxu1 %v1568_v10  ;;  %v3906_v10 = vld [vmem:[#allocation4 + $0x3c8] ss:$16 sps:$4 sm:$0xff]  }
 0x3d9   :  { %2789 = vmatpush1.bf16.msra.mxu0 %v3819_v8  ;;  %2912 = vmatpush1.bf16.msra.mxu1 %v3822_v9  ;;  %v944_v8 = vrot.slane %v4466_v61, %v943_v4  ;;  %v3903_v9 = vld [vmem:[#allocation4 + $0x3c0] ss:$16 sps:$4 sm:$0xff]  }
 0x3da   :  { %2790 = vmatprep.subr.bf16.mxu0 %v3827_v11  ;;  %2913 = vmatprep.subr.bf16.mxu1 %v3830_v12  ;;  %v3911_v11 = vld [vmem:[#allocation4 + $0x3e4] ss:$16 sps:$4 sm:$0xff]   ;;  %v3914_v12 = vld [vmem:[#allocation4 + $0x3ec] ss:$16 sps:$4 sm:$0xff]  }
 0x3dd   :  { %2791 = vmatpush1.bf16.msra.mxu0 %v3825_v13  ;;  %2914 = vmatpush1.bf16.msra.mxu1 %v3828_v14 }
 0x3de   :  { %2792 = vmatprep.subr.bf16.mxu0 %v3833_v15  ;;  %2915 = vmatprep.subr.bf16.mxu1 %v3836_v16 }
 0x3e1   :  { %2793 = vmatpush1.bf16.msra.mxu0 %v3831_v17  ;;  %2916 = vmatpush1.bf16.msra.mxu1 %v3834_v18  ;;  %v3909_v18 = vld [vmem:[#allocation4 + $0x3e0] ss:$16 sps:$4 sm:$0xff]  }
 0x3e2   :  { %2794 = vmatprep.subr.bf16.mxu0 %v3839_v19  ;;  %2917 = vmatprep.subr.bf16.mxu1 %v3842_v20  ;;  %v3912_v19 = vld [vmem:[#allocation4 + $0x3e8] ss:$16 sps:$4 sm:$0xff]  }
 0x3e5   :  { %2795 = vmatpush1.bf16.msra.mxu0 %v3837_v21  ;;  %2918 = vmatpush1.bf16.msra.mxu1 %v3840_v22  ;;  %v3917_v22 = vld [vmem:[#allocation4 + $0x404] ss:$16 sps:$4 sm:$0xff]  }
 0x3e6   :  { %2796 = vmatprep.subr.bf16.mxu0 %v3845_v23  ;;  %2919 = vmatprep.subr.bf16.mxu1 %v3848_v24  ;;  %v3920_v23 = vld [vmem:[#allocation4 + $0x40c] ss:$16 sps:$4 sm:$0xff]  }
 0x3e9   :  { %2797 = vmatpush1.bf16.msra.mxu0 %v3843_v25  ;;  %2920 = vmatpush1.bf16.msra.mxu1 %v3846_v26  ;;  %v3915_v26 = vld [vmem:[#allocation4 + $0x400] ss:$16 sps:$4 sm:$0xff]  }
 0x3ea   :  { %2798 = vmatprep.subr.bf16.mxu0 %v3851_v27  ;;  %2921 = vmatprep.subr.bf16.mxu1 %v3854_v28  ;;  %v3918_v27 = vld [vmem:[#allocation4 + $0x408] ss:$16 sps:$4 sm:$0xff]  }
 0x3ed   :  { %2799 = vmatpush1.bf16.msra.mxu0 %v3849_v29  ;;  %2922 = vmatpush1.bf16.msra.mxu1 %v3852_v30  ;;  %v3923_v29 = vld [vmem:[#allocation4 + $0x424] ss:$16 sps:$4 sm:$0xff]   ;;  %v3926_v30 = vld [vmem:[#allocation4 + $0x42c] ss:$16 sps:$4 sm:$0xff]  }
 0x3ee   :  { %2800 = vmatprep.subr.bf16.mxu0 %v3857_v31  ;;  %2923 = vmatprep.subr.bf16.mxu1 %v3860_v32  ;;  %v3921_v31 = vld [vmem:[#allocation4 + $0x420] ss:$16 sps:$4 sm:$0xff]   ;;  %v3924_v32 = vld [vmem:[#allocation4 + $0x428] ss:$16 sps:$4 sm:$0xff]  }
 0x3f1   :  { %2801 = vmatpush1.bf16.msra.mxu0 %v3855_v33  ;;  %2924 = vmatpush1.bf16.msra.mxu1 %v3858_v34  ;;  %v3929_v33 = vld [vmem:[#allocation4 + $0x444] ss:$16 sps:$4 sm:$0xff]   ;;  %v3932_v34 = vld [vmem:[#allocation4 + $0x44c] ss:$16 sps:$4 sm:$0xff]  }
 0x3f2   :  { %2802 = vmatprep.subr.bf16.mxu0 %v3863_v35  ;;  %2925 = vmatprep.subr.bf16.mxu1 %v3866_v52  ;;  %v3927_v35 = vld [vmem:[#allocation4 + $0x440] ss:$16 sps:$4 sm:$0xff]   ;;  %v3930_v52 = vld [vmem:[#allocation4 + $0x448] ss:$16 sps:$4 sm:$0xff]  }
 0x3f5   :  { %2803 = vmatpush1.bf16.msra.mxu0 %v3861_v36  ;;  %2926 = vmatpush1.bf16.msra.mxu1 %v3864_v37  ;;  %v3935_v36 = vld [vmem:[#allocation4 + $0x464] ss:$16 sps:$4 sm:$0xff]   ;;  %v3938_v37 = vld [vmem:[#allocation4 + $0x46c] ss:$16 sps:$4 sm:$0xff]  }
 0x3f6   :  { %2804 = vmatprep.subr.bf16.mxu0 %v3869_v38  ;;  %2927 = vmatprep.subr.bf16.mxu1 %v3872_v39  ;;  %v3933_v38 = vld [vmem:[#allocation4 + $0x460] ss:$16 sps:$4 sm:$0xff]   ;;  %v3936_v39 = vld [vmem:[#allocation4 + $0x468] ss:$16 sps:$4 sm:$0xff]  }
 0x3f9   :  { %2805 = vmatpush1.bf16.msra.mxu0 %v3867_v40  ;;  %2928 = vmatpush1.bf16.msra.mxu1 %v3870_v41  ;;  %v3941_v40 = vld [vmem:[#allocation4 + $0x484] ss:$16 sps:$4 sm:$0xff]   ;;  %v3944_v41 = vld [vmem:[#allocation4 + $0x48c] ss:$16 sps:$4 sm:$0xff]  }
 0x3fa   :  { %2806 = vmatprep.subr.bf16.mxu0 %v3875_v44  ;;  %2929 = vmatprep.subr.bf16.mxu1 %v3878_v46  ;;  %v3939_v44 = vld [vmem:[#allocation4 + $0x480] ss:$16 sps:$4 sm:$0xff]   ;;  %v3942_v46 = vld [vmem:[#allocation4 + $0x488] ss:$16 sps:$4 sm:$0xff]  }
 0x3fd   :  { %2807 = vmatpush1.bf16.msra.mxu0 %v3873_v47  ;;  %2930 = vmatpush1.bf16.msra.mxu1 %v3876_v48  ;;  %v3947_v47 = vld [vmem:[#allocation4 + $0x4a4] ss:$16 sps:$4 sm:$0xff]   ;;  %v3950_v48 = vld [vmem:[#allocation4 + $0x4ac] ss:$16 sps:$4 sm:$0xff]  }
 0x3fe   :  { %2808 = vmatprep.subr.bf16.mxu0 %v3881_v49  ;;  %2931 = vmatprep.subr.bf16.mxu1 %v3884_v51  ;;  %v3945_v49 = vld [vmem:[#allocation4 + $0x4a0] ss:$16 sps:$4 sm:$0xff]   ;;  %v3948_v51 = vld [vmem:[#allocation4 + $0x4a8] ss:$16 sps:$4 sm:$0xff]  }
 0x401   :  { %2809 = vmatpush1.bf16.msra.mxu0 %v3879_v53  ;;  %2932 = vmatpush1.bf16.msra.mxu1 %v3882_v54  ;;  %v3953_v53 = vld [vmem:[#allocation4 + $0x4c4] ss:$16 sps:$4 sm:$0xff]   ;;  %v3956_v54 = vld [vmem:[#allocation4 + $0x4cc] ss:$16 sps:$4 sm:$0xff]  }
 0x402   :  { %2810 = vmatprep.subr.bf16.mxu0 %v3887_v55  ;;  %2933 = vmatprep.subr.bf16.mxu1 %v3890_v56  ;;  %v3951_v55 = vld [vmem:[#allocation4 + $0x4c0] ss:$16 sps:$4 sm:$0xff]   ;;  %v3954_v56 = vld [vmem:[#allocation4 + $0x4c8] ss:$16 sps:$4 sm:$0xff]  }
 0x405   :  { %2811 = vmatpush1.bf16.msra.mxu0 %v3885_v57  ;;  %2934 = vmatpush1.bf16.msra.mxu1 %v3888_v58  ;;  %v3959_v57 = vld [vmem:[#allocation4 + $0x4e4] ss:$16 sps:$4 sm:$0xff]   ;;  %v3962_v58 = vld [vmem:[#allocation4 + $0x4ec] ss:$16 sps:$4 sm:$0xff]  }
 0x406   :  { %2812 = vmatprep.subr.bf16.mxu0 %v3893_v59  ;;  %2935 = vmatprep.subr.bf16.mxu1 %v3896_v60  ;;  %v3957_v59 = vld [vmem:[#allocation4 + $0x4e0] ss:$16 sps:$4 sm:$0xff]   ;;  %v3960_v60 = vld [vmem:[#allocation4 + $0x4e8] ss:$16 sps:$4 sm:$0xff]  }
 0x409   :  { %2813 = vmatpush1.bf16.msra.mxu0 %v3891_v62  ;;  %2936 = vmatpush1.bf16.msra.mxu1 %v3894_v63  ;;  %v3965_v62 = vld [vmem:[#allocation4 + $0x504] ss:$16 sps:$4 sm:$0xff]   ;;  %v3968_v63 = vld [vmem:[#allocation4 + $0x50c] ss:$16 sps:$4 sm:$0xff]  }
 0x40a   :  { %2814 = vmatprep.subr.bf16.mxu0 %v3899_v0  ;;  %2937 = vmatprep.subr.bf16.mxu1 %v3902_v50  ;;  %v3963_v0 = vld [vmem:[#allocation4 + $0x500] ss:$16 sps:$4 sm:$0xff]   ;;  %v3966_v50 = vld [vmem:[#allocation4 + $0x508] ss:$16 sps:$4 sm:$0xff]  }
 0x40d   :  { %2815 = vmatpush1.bf16.msra.mxu0 %v3897_v2  ;;  %2938 = vmatpush1.bf16.msra.mxu1 %v3900_v3  ;;  %v3971_v2 = vld [vmem:[#allocation4 + $0x524] ss:$16 sps:$4 sm:$0xff]   ;;  %v3974_v3 = vld [vmem:[#allocation4 + $0x52c] ss:$16 sps:$4 sm:$0xff]  }
 0x40e   :  { %2816 = vmatprep.subr.bf16.mxu0 %v3905_v5  ;;  %2939 = vmatprep.subr.bf16.mxu1 %v3908_v6  ;;  %v3969_v5 = vld [vmem:[#allocation4 + $0x520] ss:$16 sps:$4 sm:$0xff]   ;;  %v3972_v6 = vld [vmem:[#allocation4 + $0x528] ss:$16 sps:$4 sm:$0xff]  }
 0x40f   :  { %v1514_v13 = vpop.f32.mrb[4].mxu1 }
 0x410   :  { %v1515_v14 = vadd.f32 %v1514_v13, %v940_v7  ;;  %v1516_v15 = vpop.f32.mrb[5].mxu1  ;;  %v3977_v7 = vld [vmem:[#allocation4 + $0x544] ss:$16 sps:$4 sm:$0xff]   ;;  %v3981_v13 = vld [vmem:[#allocation4 + $0x560] ss:$16 sps:$4 sm:$0xff]  }
 0x411   :  { %v1517_v16 = vadd.f32 %v1516_v15, %v944_v8  ;;  %v1518_v17 = vpop.f32.mrb[6].mxu1  ;;  %2817 = vmatpush1.bf16.msra.mxu0 %v3903_v9  ;;  %2940 = vmatpush1.bf16.msra.mxu1 %v3906_v10  ;;  %v3980_v8 = vld [vmem:[#allocation4 + $0x54c] ss:$16 sps:$4 sm:$0xff]   ;;  %v3975_v9 = vld [vmem:[#allocation4 + $0x540] ss:$16 sps:$4 sm:$0xff]  }
 0x412   :  { %v1564_v20 = vmax.f32 %v1515_v14, 0.0  ;;  %v1519_v21 = vpop.f32.mrb[7].mxu1  ;;  %2818 = vmatprep.subr.bf16.mxu0 %v3911_v11  ;;  %2941 = vmatprep.subr.bf16.mxu1 %v3914_v12  ;;  %v3978_v10 = vld [vmem:[#allocation4 + $0x548] ss:$16 sps:$4 sm:$0xff]   ;;  %v3983_v11 = vld [vmem:[#allocation4 + $0x564] ss:$16 sps:$4 sm:$0xff]  }
 0x413   :  { %v1565_v24 = vmax.f32 %v1517_v16, 0.0  ;;  %v3986_v12 = vld [vmem:[#allocation4 + $0x56c] ss:$16 sps:$4 sm:$0xff]   ;;  %v3984_v14 = vld [vmem:[#allocation4 + $0x568] ss:$16 sps:$4 sm:$0xff]   ;;  %v947_v21 = vsub.s32 4, %v4430_v42 }
 0x414   :  { %v1570_v28 = vpack.c.bf16 %v1564_v20, %v1564_v20  ;;  %v3989_v15 = vld [vmem:[#allocation4 + $0x584] ss:$16 sps:$4 sm:$0xff]   ;;  %v3992_v16 = vld [vmem:[#allocation4 + $0x58c] ss:$16 sps:$4 sm:$0xff]   ;;  %v3987_v17 = vld [vmem:[#allocation4 + $0x580] ss:$16 sps:$4 sm:$0xff]  }
 0x415   :  { %v1571_v25 = vpack.c.bf16 %v1565_v24, %v1565_v24  ;;  %2819 = vmatpush1.bf16.msra.mxu0 %v3909_v18  ;;  %2942 = vmatpush1.bf16.msra.mxu1 %v3912_v19  ;;  %v3990_v18 = vld [vmem:[#allocation4 + $0x588] ss:$16 sps:$4 sm:$0xff]   ;;  %v3995_v19 = vld [vmem:[#allocation4 + $0x5a4] ss:$16 sps:$4 sm:$0xff]   ;;  %v3998_v20 = vld [vmem:[#allocation4 + $0x5ac] ss:$16 sps:$4 sm:$0xff]  }
 0x416   :  { %2829 = vmatprep.subr.bf16.mxu0 %v3917_v22  ;;  %2952 = vmatprep.subr.bf16.mxu1 %v3920_v23  ;;  %v3993_v22 = vld [vmem:[#allocation4 + $0x5a0] ss:$16 sps:$4 sm:$0xff]   ;;  %v3996_v23 = vld [vmem:[#allocation4 + $0x5a8] ss:$16 sps:$4 sm:$0xff]   ;;  %v951_v24 = vsub.s32 5, %v4430_v42 }
 0x417   :  { %2820 = vmatprep.mubr.bf16.mxu0 %v1571_v25  ;;  %2943 = vmatprep.mubr.bf16.mxu1 %v1571_v25  ;;  %v4001_v25 = vld [vmem:[#allocation4 + $0x5c4] ss:$16 sps:$4 sm:$0xff]  }
 0x418   :  { %2821 = vmatmul.mubr.bf16.vlgmr.msra.gmra.mrb[4].mxu0 %v1570_v28  ;;  %2944 = vmatmul.mubr.bf16.vlgmr.msra.gmra.mrb[12].mxu1 %v1570_v28  ;;  %v952_v28 = vrot.slane %v4466_v61, %v951_v24 }
 0x419   :  { %2830 = vmatpush1.bf16.msra.mxu0 %v3915_v26  ;;  %2953 = vmatpush1.bf16.msra.mxu1 %v3918_v27  ;;  %v4004_v26 = vld [vmem:[#allocation4 + $0x5cc] ss:$16 sps:$4 sm:$0xff]   ;;  %v948_v27 = vrot.slane %v4466_v61, %v947_v21 }
 0x41a   :  { %2831 = vmatprep.subr.bf16.mxu0 %v3923_v29  ;;  %2954 = vmatprep.subr.bf16.mxu1 %v3926_v30  ;;  %v3999_v29 = vld [vmem:[#allocation4 + $0x5c0] ss:$16 sps:$4 sm:$0xff]   ;;  %v4002_v30 = vld [vmem:[#allocation4 + $0x5c8] ss:$16 sps:$4 sm:$0xff]  }
 0x41d   :  { %2832 = vmatpush1.bf16.msra.mxu0 %v3921_v31  ;;  %2955 = vmatpush1.bf16.msra.mxu1 %v3924_v32  ;;  %v4007_v31 = vld [vmem:[#allocation4 + $0x5e4] ss:$16 sps:$4 sm:$0xff]   ;;  %v4010_v32 = vld [vmem:[#allocation4 + $0x5ec] ss:$16 sps:$4 sm:$0xff]  }
 0x41e   :  { %2833 = vmatprep.subr.bf16.mxu0 %v3929_v33  ;;  %2956 = vmatprep.subr.bf16.mxu1 %v3932_v34 }
 0x421   :  { %2834 = vmatpush1.bf16.msra.mxu0 %v3927_v35  ;;  %2957 = vmatpush1.bf16.msra.mxu1 %v3930_v52 }
 0x422   :  { %2835 = vmatprep.subr.bf16.mxu0 %v3935_v36  ;;  %2958 = vmatprep.subr.bf16.mxu1 %v3938_v37  ;;  %v4005_v37 = vld [vmem:[#allocation4 + $0x5e0] ss:$16 sps:$4 sm:$0xff]  }
 0x425   :  { %2836 = vmatpush1.bf16.msra.mxu0 %v3933_v38  ;;  %2959 = vmatpush1.bf16.msra.mxu1 %v3936_v39  ;;  %v4008_v38 = vld [vmem:[#allocation4 + $0x5e8] ss:$16 sps:$4 sm:$0xff]  }
 0x426   :  { %2837 = vmatprep.subr.bf16.mxu0 %v3941_v40  ;;  %2960 = vmatprep.subr.bf16.mxu1 %v3944_v41 }
 0x429   :  { %2838 = vmatpush1.bf16.msra.mxu0 %v3939_v44  ;;  %2961 = vmatpush1.bf16.msra.mxu1 %v3942_v46  ;;  %v52_v46 = vld [vmem:[%s4509_s4 + $0xc] sm:$0xf] }
 0x42a   :  { %2839 = vmatprep.subr.bf16.mxu0 %v3947_v47  ;;  %2962 = vmatprep.subr.bf16.mxu1 %v3950_v48  ;;  %v1770_v47 = vrot.slane %v52_v46, %v4433_v43  ;;  %v1778_v48 = vrot.slane %v52_v46, %v939_v1 }
 0x42d   :  { %2840 = vmatpush1.bf16.msra.mxu0 %v3945_v49  ;;  %2963 = vmatpush1.bf16.msra.mxu1 %v3948_v51  ;;  %v1774_v49 = vrot.slane %v52_v46, %v4439_v45  ;;  %v1782_v51 = vrot.slane %v52_v46, %v943_v4 }
 0x42e   :  { %2841 = vmatprep.subr.bf16.mxu0 %v3953_v53  ;;  %2964 = vmatprep.subr.bf16.mxu1 %v3956_v54 }
 0x431   :  { %2842 = vmatpush1.bf16.msra.mxu0 %v3951_v55  ;;  %2965 = vmatpush1.bf16.msra.mxu1 %v3954_v56 }
 0x432   :  { %2843 = vmatprep.subr.bf16.mxu0 %v3959_v57  ;;  %2966 = vmatprep.subr.bf16.mxu1 %v3962_v58 }
 0x435   :  { %2844 = vmatpush1.bf16.msra.mxu0 %v3957_v59  ;;  %2967 = vmatpush1.bf16.msra.mxu1 %v3960_v60 }
 0x436   :  { %2845 = vmatprep.subr.bf16.mxu0 %v3965_v62  ;;  %2968 = vmatprep.subr.bf16.mxu1 %v3968_v63 }
 0x439   :  { %2846 = vmatpush1.bf16.msra.mxu0 %v3963_v0  ;;  %2969 = vmatpush1.bf16.msra.mxu1 %v3966_v50 }
 0x43a   :  { %2847 = vmatprep.subr.bf16.mxu0 %v3971_v2  ;;  %2970 = vmatprep.subr.bf16.mxu1 %v3974_v3 }
 0x43d   :  { %2848 = vmatpush1.bf16.msra.mxu0 %v3969_v5  ;;  %2971 = vmatpush1.bf16.msra.mxu1 %v3972_v6 }
 0x43e   :  { %2849 = vmatprep.subr.bf16.mxu0 %v3977_v7  ;;  %2972 = vmatprep.subr.bf16.mxu1 %v3980_v8 }
 0x441   :  { %2850 = vmatpush1.bf16.msra.mxu0 %v3975_v9  ;;  %2973 = vmatpush1.bf16.msra.mxu1 %v3978_v10 }
 0x442   :  { %2851 = vmatprep.subr.bf16.mxu0 %v3983_v11  ;;  %2974 = vmatprep.subr.bf16.mxu1 %v3986_v12 }
 0x445   :  { %2852 = vmatpush1.bf16.msra.mxu0 %v3981_v13  ;;  %2975 = vmatpush1.bf16.msra.mxu1 %v3984_v14 }
 0x446   :  { %2853 = vmatprep.subr.bf16.mxu0 %v3989_v15  ;;  %2976 = vmatprep.subr.bf16.mxu1 %v3992_v16 }
 0x449   :  { %2854 = vmatpush1.bf16.msra.mxu0 %v3987_v17  ;;  %2977 = vmatpush1.bf16.msra.mxu1 %v3990_v18 }
 0x44a   :  { %2855 = vmatprep.subr.bf16.mxu0 %v3995_v19  ;;  %2978 = vmatprep.subr.bf16.mxu1 %v3998_v20 }
 0x44d   :  { %2856 = vmatpush1.bf16.msra.mxu0 %v3993_v22  ;;  %2979 = vmatpush1.bf16.msra.mxu1 %v3996_v23 }
 0x44e   :  { %2857 = vmatprep.subr.bf16.mxu0 %v4001_v25  ;;  %2980 = vmatprep.subr.bf16.mxu1 %v4004_v26 }
 0x44f   :  { %v1555_v33 = vpop.f32.mrb[8].mxu1 }
 0x450   :  { %v1556_v34 = vadd.f32 %v1555_v33, %v948_v27  ;;  %v1557_v35 = vpop.f32.mrb[9].mxu1 }
 0x451   :  { %v1558_v52 = vadd.f32 %v1557_v35, %v952_v28  ;;  %v1559_v36 = vpop.f32.mrb[10].mxu1  ;;  %2858 = vmatpush1.bf16.msra.mxu0 %v3999_v29  ;;  %2981 = vmatpush1.bf16.msra.mxu1 %v4002_v30 }
 0x452   :  { %v1566_v39 = vmax.f32 %v1556_v34, 0.0  ;;  %v1560_v40 = vpop.f32.mrb[11].mxu1  ;;  %2859 = vmatprep.subr.bf16.mxu0 %v4007_v31  ;;  %2982 = vmatprep.subr.bf16.mxu1 %v4010_v32 }
 0x453   :  { %v1567_v61 = vmax.f32 %v1558_v52, 0.0 }
 0x454   :  { %v1572_v44 = vpack.c.bf16 %v1566_v39, %v1566_v39 }
 0x455   :  { %v1573_v41 = vpack.c.bf16 %v1567_v61, %v1567_v61  ;;  %2860 = vmatpush1.bf16.msra.mxu0 %v4005_v37  ;;  %2983 = vmatpush1.bf16.msra.mxu1 %v4008_v38 }
 0x457   :  { %2861 = vmatprep.mubr.bf16.mxu0 %v1573_v41  ;;  %2984 = vmatprep.mubr.bf16.mxu1 %v1573_v41 }
 0x458   :  { %2862 = vmatmul.mubr.bf16.vlgmr.msra.gmra.mrb[4].mxu0 %v1572_v44  ;;  %2985 = vmatmul.mubr.bf16.vlgmr.msra.gmra.mrb[12].mxu1 %v1572_v44 }
 0x52b   :  { %v2863_v53 = vpop.f32.mrb[4].mxu0  ;;  %v2986_v54 = vpop.f32.mrb[12].mxu1 }
 0x52c   :  { %v3395_v55 = vadd.f32 %v2863_v53, %v1770_v47  ;;  %v3397_v56 = vadd.f32 %v2986_v54, %v1778_v48  ;;  %v2865_v57 = vpop.f32.mrb[5].mxu0  ;;  %v2988_v58 = vpop.f32.mrb[13].mxu1 }
 0x52d   :  { %v3396_v59 = vadd.f32 %v2865_v57, %v1774_v49  ;;  %v3398_v60 = vadd.f32 %v2988_v58, %v1782_v51  ;;  %v2867_v62 = vpop.f32.mrb[6].mxu0  ;;  %v2990_v63 = vpop.f32.mrb[14].mxu1 }
 0x52e   :  { %2993 = vst [vmem:[%s4510_s5] sm:$0xff] %v3395_v55  ;;  %2995 = vst [vmem:[%s4510_s5 + $0x10] sm:$0xff] %v3397_v56  ;;  %v2868_v42 = vpop.f32.mrb[7].mxu0  ;;  %v2991_v43 = vpop.f32.mrb[15].mxu1 }
 0x52f   :  { %2994 = vst [vmem:[%s4510_s5 + $0x8] sm:$0xff] %v3396_v59  ;;  %2996 = vst [vmem:[%s4510_s5 + $0x18] sm:$0xff] %v3398_v60 }
 0x530   :  { %3001 = vsyncpa [#allocation3], 1 }
 0x531   :  { %3002 = vsyncpa [#allocation5], 1 }

</bundles_post_ra>
